<compile_context>
chip_gen: v7x
topology: tpu7x:2x2x1
jax: 0.10.0
libtpu: 0.0.40
codegen_flags: <defaults>
</compile_context>

<pallas_src>
import jax
import jax.numpy as jnp
from jax.experimental import pallas as pl
from jax.experimental.pallas import tpu as pltpu

EPS = 1e-5
NEG_SLOPE = 0.01  # torch.nn.LeakyReLU default


def down_fused_kernel(xp_ref, w_ref, gamma_ref, beta_ref, out_ref, pad_ref, patch_ref):
    """Fused conv3x3(pad=1) + BatchNorm2d(train) + LeakyReLU.

    xp_ref    : (N, Hp, Wp, Cin)   pooled input, NHWC
    w_ref     : (9*Cin, Cout)      conv weights, rows ordered (ky, kx, ci)
    gamma_ref : (1, Cout)          BN weight
    beta_ref  : (1, Cout)          BN bias
    out_ref   : (N, Cout, Hp*Wp)   output, NCHW-flat
    pad_ref   : VMEM (N, Hp+2, Wp+2, Cin)   zero-padded pooled input (scratch)
    patch_ref : VMEM (N*Hp*Wp, 9*Cin)       im2col patch matrix (scratch)
    """
    N, Hp, Wp, Cin = xp_ref.shape
    Cout = w_ref.shape[1]
    HW = Hp * Wp
    M = N * HW

    # padding=1 built in VMEM (no jnp.pad pass over HBM in the wrapper).
    pad_ref[...] = jnp.zeros_like(pad_ref)
    pad_ref[:, 1:Hp + 1, 1:Wp + 1, :] = xp_ref[...]

    # im2col: build the (M, 9*Cin) patch once in VMEM scratch (static slices only).
    for ky in range(3):
        for kx in range(3):
            t = ky * 3 + kx
            tap = pad_ref[:, ky:ky + Hp, kx:kx + Wp, :]            # (N, Hp, Wp, Cin)
            patch_ref[:, t * Cin:(t + 1) * Cin] = tap.reshape(M, Cin)

    # Single MXU matmul for the whole batch.
    acc = jnp.dot(patch_ref[...], w_ref[...],
                  preferred_element_type=jnp.float32)              # (M, Cout)

    # BatchNorm2d training-mode batch statistics (biased variance), per channel,
    # plus the scale/shift math -- all inside the kernel epilogue.
    # (Single-pass E[x^2]-E[x]^2 is fine at these magnitudes; see review note.)
    inv_cnt = jnp.float32(1.0 / M)
    mean = acc.sum(axis=0, keepdims=True) * inv_cnt                # (1, Cout)
    var = (acc * acc).sum(axis=0, keepdims=True) * inv_cnt - mean * mean
    scale = gamma_ref[...] * jax.lax.rsqrt(var + EPS)
    shift = beta_ref[...] - mean * scale

    y = acc * scale + shift
    y = jnp.where(y >= 0, y, NEG_SLOPE * y)                        # LeakyReLU(0.01)

    # Store directly in NCHW-flat layout: lane dim = Hp*Wp (dense stores).
    for n in range(N):
        out_ref[n, :, :] = y[n * HW:(n + 1) * HW, :].T.astype(out_ref.dtype)


@jax.jit
def down_forward(x_nchw, weight_oihw, gamma, beta):
    """Forward pass of Down. x_nchw: (N, Cin, H, W) -> (N, Cout, H//2, W//2)."""
    N, Cin, H, W = x_nchw.shape
    Cout = weight_oihw.shape[0]
    Hp, Wp = H // 2, W // 2
    HW = Hp * Wp

    x = x_nchw.astype(jnp.float32)
    # MaxPool2d(2) + layout to NHWC for the kernel (tiny fused XLA op on the pooled tensor).
    pooled = jnp.max(x.reshape(N, Cin, Hp, 2, Wp, 2), axis=(3, 5))   # (N, Cin, Hp, Wp)
    xp = jnp.transpose(pooled, (0, 2, 3, 1))                         # (N, Hp, Wp, Cin)

    # Conv weight (Cout, Cin, 3, 3) -> (9*Cin, Cout), rows ordered (ky, kx, ci)
    # to match the im2col column order built inside the kernel.
    w2 = jnp.transpose(weight_oihw, (2, 3, 1, 0)).reshape(9 * Cin, Cout).astype(jnp.float32)
    gamma2 = gamma.reshape(1, Cout).astype(jnp.float32)
    beta2 = beta.reshape(1, Cout).astype(jnp.float32)

    out_flat = pl.pallas_call(
        down_fused_kernel,
        out_shape=jax.ShapeDtypeStruct((N, Cout, HW), jnp.float32),
        grid_spec=pltpu.PrefetchScalarGridSpec(
            num_scalar_prefetch=0,
            grid=(1,),
            in_specs=[
                pl.BlockSpec((N, Hp, Wp, Cin), lambda i: (0, 0, 0, 0)),
                pl.BlockSpec((9 * Cin, Cout), lambda i: (0, 0)),
                pl.BlockSpec((1, Cout), lambda i: (0, 0)),
                pl.BlockSpec((1, Cout), lambda i: (0, 0)),
            ],
            out_specs=pl.BlockSpec((N, Cout, HW), lambda i: (0, 0, 0)),
            scratch_shapes=[
                pltpu.VMEM((N, Hp + 2, Wp + 2, Cin), jnp.float32),   # padded pooled input
                pltpu.VMEM((N * HW, 9 * Cin), jnp.float32),          # im2col patch
            ],
        ),
        compiler_params=pltpu.CompilerParams(
            dimension_semantics=("arbitrary",)),
    )(xp, w2, gamma2, beta2)

    return out_flat.reshape(N, Cout, Hp, Wp)


def reference(x_nchw, weight_oihw, gamma, beta):
    """Pure-JAX reference mimicking the PyTorch Down module (training-mode BN)."""
    xp = jax.lax.reduce_window(x_nchw, -jnp.inf, jax.lax.max,
                               (1, 1, 2, 2), (1, 1, 2, 2), "VALID")
    y = jax.lax.conv_general_dilated(
        xp, weight_oihw, window_strides=(1, 1), padding="SAME",
        dimension_numbers=("NCHW", "OIHW", "NCHW"))
    mean = y.mean(axis=(0, 2, 3), keepdims=True)
    var = ((y - mean) ** 2).mean(axis=(0, 2, 3), keepdims=True)      # biased
    yhat = (y - mean) * jax.lax.rsqrt(var + EPS)
    yhat = yhat * gamma[None, :, None, None] + beta[None, :, None, None]
    return jnp.where(yhat >= 0, yhat, NEG_SLOPE * yhat)


if __name__ == "__main__":
    key = jax.random.PRNGKey(0)
    k_x, k_w, k_g, k_b = jax.random.split(key, 4)

    N, Cin, Cout, H, W = 2, 4, 8, 16, 16

    x = jax.random.normal(k_x, (N, Cin, H, W), jnp.float32)
    weight = jax.random.normal(k_w, (Cout, Cin, 3, 3), jnp.float32) * 0.1  # Conv2d weight
    gamma = 1.0 + 0.1 * jax.random.normal(k_g, (Cout,), jnp.float32)       # BN weight
    beta = 0.1 * jax.random.normal(k_b, (Cout,), jnp.float32)              # BN bias

    out = down_forward(x, weight, gamma, beta)
    out = jax.block_until_ready(out)

    ref = reference(x, weight, gamma, beta)
    assert out.shape == (N, Cout, H // 2, W // 2), out.shape
    max_err = float(jnp.max(jnp.abs(out - ref)))
    assert max_err < 1e-4, f"max abs error {max_err}"

    print("KERNEL_OK")
</pallas_src>

<mosaic_0001>
module attributes {stable_mosaic.version = 11 : i64} {
  func.func @down_fused_kernel(%arg0: i32, %arg1: memref<2x8x8x4xf32, #tpu.memory_space<vmem>>, %arg2: memref<36x8xf32, #tpu.memory_space<vmem>>, %arg3: memref<1x8xf32, #tpu.memory_space<vmem>>, %arg4: memref<1x8xf32, #tpu.memory_space<vmem>>, %arg5: memref<2x8x64xf32, #tpu.memory_space<vmem>>, %arg6: memref<2x10x10x4xf32, #tpu.memory_space<vmem>>, %arg7: memref<128x36xf32, #tpu.memory_space<vmem>>) attributes {dimension_semantics = [#tpu.dimension_semantics<arbitrary>], iteration_bounds = array<i64: 1>, scalar_prefetch = 0 : i64, scratch_operands = 2 : i64, tpu.core_type = #tpu.core_type<tc>, window_params = [{pipeline_mode = #tpu.pipeline_mode<synchronous>, transform_indices = @transform_0, window_bounds = array<i64: 2, 8, 8, 4>}, {pipeline_mode = #tpu.pipeline_mode<synchronous>, transform_indices = @transform_1, window_bounds = array<i64: 36, 8>}, {pipeline_mode = #tpu.pipeline_mode<synchronous>, transform_indices = @transform_2, window_bounds = array<i64: 1, 8>}, {pipeline_mode = #tpu.pipeline_mode<synchronous>, transform_indices = @transform_3, window_bounds = array<i64: 1, 8>}, {pipeline_mode = #tpu.pipeline_mode<synchronous>, transform_indices = @transform_4, window_bounds = array<i64: 2, 8, 64>}]} {
    %cst = arith.constant 0.000000e+00 : f32
    %0 = vector.broadcast %cst : f32 to vector<2x10x10x4xf32>
    %c0 = arith.constant 0 : index
    %c0_0 = arith.constant 0 : index
    %c0_1 = arith.constant 0 : index
    %c0_2 = arith.constant 0 : index
    %1 = vector.load %arg6[%c0, %c0_0, %c0_1, %c0_2] : memref<2x10x10x4xf32, #tpu.memory_space<vmem>>, vector<2x10x10x4xf32>
    tpu.vector_store %arg6[%c0, %c0_0, %c0_1, %c0_2], %0 {strides = array<i32>} : memref<2x10x10x4xf32, #tpu.memory_space<vmem>>, vector<2x10x10x4xf32>,
    %c0_3 = arith.constant 0 : index
    %c0_4 = arith.constant 0 : index
    %c0_5 = arith.constant 0 : index
    %c0_6 = arith.constant 0 : index
    %2 = vector.load %arg1[%c0_3, %c0_4, %c0_5, %c0_6] : memref<2x8x8x4xf32, #tpu.memory_space<vmem>>, vector<2x8x8x4xf32>
    %c0_7 = arith.constant 0 : index
    %c1 = arith.constant 1 : index
    %c1_8 = arith.constant 1 : index
    %c0_9 = arith.constant 0 : index
    %3 = vector.load %arg6[%c0_7, %c1, %c1_8, %c0_9] : memref<2x10x10x4xf32, #tpu.memory_space<vmem>>, vector<2x8x8x4xf32>
    tpu.vector_store %arg6[%c0_7, %c1, %c1_8, %c0_9], %2 {strides = array<i32>} : memref<2x10x10x4xf32, #tpu.memory_space<vmem>>, vector<2x8x8x4xf32>,
    %c0_10 = arith.constant 0 : index
    %c0_11 = arith.constant 0 : index
    %c0_12 = arith.constant 0 : index
    %c0_13 = arith.constant 0 : index
    %4 = vector.load %arg6[%c0_10, %c0_11, %c0_12, %c0_13] : memref<2x10x10x4xf32, #tpu.memory_space<vmem>>, vector<2x8x8x4xf32>
    %5 = vector.shape_cast %4 : vector<2x8x8x4xf32> to vector<128x4xf32>
    %c0_14 = arith.constant 0 : index
    %c0_15 = arith.constant 0 : index
    %6 = vector.load %arg7[%c0_14, %c0_15] : memref<128x36xf32, #tpu.memory_space<vmem>>, vector<128x4xf32>
    tpu.vector_store %arg7[%c0_14, %c0_15], %5 {strides = array<i32>} : memref<128x36xf32, #tpu.memory_space<vmem>>, vector<128x4xf32>,
    %c0_16 = arith.constant 0 : index
    %c0_17 = arith.constant 0 : index
    %c1_18 = arith.constant 1 : index
    %c0_19 = arith.constant 0 : index
    %7 = vector.load %arg6[%c0_16, %c0_17, %c1_18, %c0_19] : memref<2x10x10x4xf32, #tpu.memory_space<vmem>>, vector<2x8x8x4xf32>
    %8 = vector.shape_cast %7 : vector<2x8x8x4xf32> to vector<128x4xf32>
    %c0_20 = arith.constant 0 : index
    %c4 = arith.constant 4 : index
    %9 = vector.load %arg7[%c0_20, %c4] : memref<128x36xf32, #tpu.memory_space<vmem>>, vector<128x4xf32>
    tpu.vector_store %arg7[%c0_20, %c4], %8 {strides = array<i32>} : memref<128x36xf32, #tpu.memory_space<vmem>>, vector<128x4xf32>,
    %c0_21 = arith.constant 0 : index
    %c0_22 = arith.constant 0 : index
    %c2 = arith.constant 2 : index
    %c0_23 = arith.constant 0 : index
    %10 = vector.load %arg6[%c0_21, %c0_22, %c2, %c0_23] : memref<2x10x10x4xf32, #tpu.memory_space<vmem>>, vector<2x8x8x4xf32>
    %11 = vector.shape_cast %10 : vector<2x8x8x4xf32> to vector<128x4xf32>
    %c0_24 = arith.constant 0 : index
    %c8 = arith.constant 8 : index
    %12 = vector.load %arg7[%c0_24, %c8] : memref<128x36xf32, #tpu.memory_space<vmem>>, vector<128x4xf32>
    tpu.vector_store %arg7[%c0_24, %c8], %11 {strides = array<i32>} : memref<128x36xf32, #tpu.memory_space<vmem>>, vector<128x4xf32>,
    %c0_25 = arith.constant 0 : index
    %c1_26 = arith.constant 1 : index
    %c0_27 = arith.constant 0 : index
    %c0_28 = arith.constant 0 : index
    %13 = vector.load %arg6[%c0_25, %c1_26, %c0_27, %c0_28] : memref<2x10x10x4xf32, #tpu.memory_space<vmem>>, vector<2x8x8x4xf32>
    %14 = vector.shape_cast %13 : vector<2x8x8x4xf32> to vector<128x4xf32>
    %c0_29 = arith.constant 0 : index
    %c12 = arith.constant 12 : index
    %15 = vector.load %arg7[%c0_29, %c12] : memref<128x36xf32, #tpu.memory_space<vmem>>, vector<128x4xf32>
    tpu.vector_store %arg7[%c0_29, %c12], %14 {strides = array<i32>} : memref<128x36xf32, #tpu.memory_space<vmem>>, vector<128x4xf32>,
    %c0_30 = arith.constant 0 : index
    %c1_31 = arith.constant 1 : index
    %c1_32 = arith.constant 1 : index
    %c0_33 = arith.constant 0 : index
    %16 = vector.load %arg6[%c0_30, %c1_31, %c1_32, %c0_33] : memref<2x10x10x4xf32, #tpu.memory_space<vmem>>, vector<2x8x8x4xf32>
    %17 = vector.shape_cast %16 : vector<2x8x8x4xf32> to vector<128x4xf32>
    %c0_34 = arith.constant 0 : index
    %c16 = arith.constant 16 : index
    %18 = vector.load %arg7[%c0_34, %c16] : memref<128x36xf32, #tpu.memory_space<vmem>>, vector<128x4xf32>
    tpu.vector_store %arg7[%c0_34, %c16], %17 {strides = array<i32>} : memref<128x36xf32, #tpu.memory_space<vmem>>, vector<128x4xf32>,
    %c0_35 = arith.constant 0 : index
    %c1_36 = arith.constant 1 : index
    %c2_37 = arith.constant 2 : index
    %c0_38 = arith.constant 0 : index
    %19 = vector.load %arg6[%c0_35, %c1_36, %c2_37, %c0_38] : memref<2x10x10x4xf32, #tpu.memory_space<vmem>>, vector<2x8x8x4xf32>
    %20 = vector.shape_cast %19 : vector<2x8x8x4xf32> to vector<128x4xf32>
    %c0_39 = arith.constant 0 : index
    %c20 = arith.constant 20 : index
    %21 = vector.load %arg7[%c0_39, %c20] : memref<128x36xf32, #tpu.memory_space<vmem>>, vector<128x4xf32>
    tpu.vector_store %arg7[%c0_39, %c20], %20 {strides = array<i32>} : memref<128x36xf32, #tpu.memory_space<vmem>>, vector<128x4xf32>,
    %c0_40 = arith.constant 0 : index
    %c2_41 = arith.constant 2 : index
    %c0_42 = arith.constant 0 : index
    %c0_43 = arith.constant 0 : index
    %22 = vector.load %arg6[%c0_40, %c2_41, %c0_42, %c0_43] : memref<2x10x10x4xf32, #tpu.memory_space<vmem>>, vector<2x8x8x4xf32>
    %23 = vector.shape_cast %22 : vector<2x8x8x4xf32> to vector<128x4xf32>
    %c0_44 = arith.constant 0 : index
    %c24 = arith.constant 24 : index
    %24 = vector.load %arg7[%c0_44, %c24] : memref<128x36xf32, #tpu.memory_space<vmem>>, vector<128x4xf32>
    tpu.vector_store %arg7[%c0_44, %c24], %23 {strides = array<i32>} : memref<128x36xf32, #tpu.memory_space<vmem>>, vector<128x4xf32>,
    %c0_45 = arith.constant 0 : index
    %c2_46 = arith.constant 2 : index
    %c1_47 = arith.constant 1 : index
    %c0_48 = arith.constant 0 : index
    %25 = vector.load %arg6[%c0_45, %c2_46, %c1_47, %c0_48] : memref<2x10x10x4xf32, #tpu.memory_space<vmem>>, vector<2x8x8x4xf32>
    %26 = vector.shape_cast %25 : vector<2x8x8x4xf32> to vector<128x4xf32>
    %c0_49 = arith.constant 0 : index
    %c28 = arith.constant 28 : index
    %27 = vector.load %arg7[%c0_49, %c28] : memref<128x36xf32, #tpu.memory_space<vmem>>, vector<128x4xf32>
    tpu.vector_store %arg7[%c0_49, %c28], %26 {strides = array<i32>} : memref<128x36xf32, #tpu.memory_space<vmem>>, vector<128x4xf32>,
    %c0_50 = arith.constant 0 : index
    %c2_51 = arith.constant 2 : index
    %c2_52 = arith.constant 2 : index
    %c0_53 = arith.constant 0 : index
    %28 = vector.load %arg6[%c0_50, %c2_51, %c2_52, %c0_53] : memref<2x10x10x4xf32, #tpu.memory_space<vmem>>, vector<2x8x8x4xf32>
    %29 = vector.shape_cast %28 : vector<2x8x8x4xf32> to vector<128x4xf32>
    %c0_54 = arith.constant 0 : index
    %c32 = arith.constant 32 : index
    %30 = vector.load %arg7[%c0_54, %c32] : memref<128x36xf32, #tpu.memory_space<vmem>>, vector<128x4xf32>
    tpu.vector_store %arg7[%c0_54, %c32], %29 {strides = array<i32>} : memref<128x36xf32, #tpu.memory_space<vmem>>, vector<128x4xf32>,
    %c0_55 = arith.constant 0 : index
    %c0_56 = arith.constant 0 : index
    %31 = vector.load %arg7[%c0_55, %c0_56] : memref<128x36xf32, #tpu.memory_space<vmem>>, vector<128x36xf32>
    %c0_57 = arith.constant 0 : index
    %c0_58 = arith.constant 0 : index
    %32 = vector.load %arg2[%c0_57, %c0_58] : memref<36x8xf32, #tpu.memory_space<vmem>>, vector<36x8xf32>
    %cst_59 = arith.constant dense<0.000000e+00> : vector<128x8xf32>
    %33 = tpu.matmul %31, %32, %cst_59 {dimension_numbers = #tpu.dot_dimension_numbers<[1], [0], [0], [1], [0, 0, 1, 1], [], []>} : vector<128x36xf32>, vector<36x8xf32>, vector<128x8xf32> -> vector<128x8xf32>
    %cst_60 = arith.constant dense<0.000000e+00> : vector<8xf32>
    %34 = vector.multi_reduction <add>, %33, %cst_60 [0] : vector<128x8xf32> to vector<8xf32>
    %35 = vector.shape_cast %34 : vector<8xf32> to vector<1x8xf32>
    %cst_61 = arith.constant 7.812500e-03 : f32
    %36 = vector.broadcast %cst_61 : f32 to vector<1x8xf32>
    %37 = arith.mulf %35, %36 : vector<1x8xf32>
    %38 = arith.mulf %33, %33 : vector<128x8xf32>
    %cst_62 = arith.constant dense<0.000000e+00> : vector<8xf32>
    %39 = vector.multi_reduction <add>, %38, %cst_62 [0] : vector<128x8xf32> to vector<8xf32>
    %40 = vector.shape_cast %39 : vector<8xf32> to vector<1x8xf32>
    %cst_63 = arith.constant 7.812500e-03 : f32
    %41 = vector.broadcast %cst_63 : f32 to vector<1x8xf32>
    %42 = arith.mulf %40, %41 : vector<1x8xf32>
    %43 = arith.mulf %37, %37 : vector<1x8xf32>
    %44 = arith.subf %42, %43 : vector<1x8xf32>
    %c0_64 = arith.constant 0 : index
    %c0_65 = arith.constant 0 : index
    %45 = vector.load %arg3[%c0_64, %c0_65] : memref<1x8xf32, #tpu.memory_space<vmem>>, vector<1x8xf32>
    %cst_66 = arith.constant 9.99999974E-6 : f32
    %46 = vector.broadcast %cst_66 : f32 to vector<1x8xf32>
    %47 = arith.addf %44, %46 : vector<1x8xf32>
    %48 = math.rsqrt %47 : vector<1x8xf32>
    %49 = arith.mulf %45, %48 : vector<1x8xf32>
    %c0_67 = arith.constant 0 : index
    %c0_68 = arith.constant 0 : index
    %50 = vector.load %arg4[%c0_67, %c0_68] : memref<1x8xf32, #tpu.memory_space<vmem>>, vector<1x8xf32>
    %51 = arith.mulf %37, %49 : vector<1x8xf32>
    %52 = arith.subf %50, %51 : vector<1x8xf32>
    %53 = vector.broadcast %49 : vector<1x8xf32> to vector<128x8xf32>
    %54 = arith.mulf %33, %53 : vector<128x8xf32>
    %55 = vector.broadcast %52 : vector<1x8xf32> to vector<128x8xf32>
    %56 = arith.addf %54, %55 : vector<128x8xf32>
    %cst_69 = arith.constant 0.000000e+00 : f32
    %57 = vector.broadcast %cst_69 : f32 to vector<128x8xf32>
    %58 = arith.cmpf oge, %56, %57 : vector<128x8xf32>
    %cst_70 = arith.constant 0.00999999977 : f32
    %59 = vector.broadcast %cst_70 : f32 to vector<128x8xf32>
    %60 = arith.mulf %59, %56 : vector<128x8xf32>
    %61 = arith.select %58, %56, %60 : vector<128x8xi1>, vector<128x8xf32>
    %62 = vector.extract_strided_slice %61 {offsets = [0, 0], sizes = [64, 8], strides = [1, 1]} : vector<128x8xf32> to vector<64x8xf32>
    %63 = tpu.transpose %62, [1, 0] : vector<64x8xf32> -> vector<8x64xf32>
    %c0_71 = arith.constant 0 : index
    %c0_72 = arith.constant 0 : index
    %c0_73 = arith.constant 0 : index
    %64 = vector.load %arg5[%c0_71, %c0_72, %c0_73] : memref<2x8x64xf32, #tpu.memory_space<vmem>>, vector<1x8x64xf32>
    %65 = vector.shape_cast %64 : vector<1x8x64xf32> to vector<8x64xf32>
    %66 = vector.shape_cast %63 : vector<8x64xf32> to vector<1x8x64xf32>
    tpu.vector_store %arg5[%c0_71, %c0_72, %c0_73], %66 {strides = array<i32>} : memref<2x8x64xf32, #tpu.memory_space<vmem>>, vector<1x8x64xf32>,
    %67 = vector.extract_strided_slice %61 {offsets = [64, 0], sizes = [64, 8], strides = [1, 1]} : vector<128x8xf32> to vector<64x8xf32>
    %68 = tpu.transpose %67, [1, 0] : vector<64x8xf32> -> vector<8x64xf32>
    %c1_74 = arith.constant 1 : index
    %c0_75 = arith.constant 0 : index
    %c0_76 = arith.constant 0 : index
    %69 = vector.load %arg5[%c1_74, %c0_75, %c0_76] : memref<2x8x64xf32, #tpu.memory_space<vmem>>, vector<1x8x64xf32>
    %70 = vector.shape_cast %69 : vector<1x8x64xf32> to vector<8x64xf32>
    %71 = vector.shape_cast %68 : vector<8x64xf32> to vector<1x8x64xf32>
    tpu.vector_store %arg5[%c1_74, %c0_75, %c0_76], %71 {strides = array<i32>} : memref<2x8x64xf32, #tpu.memory_space<vmem>>, vector<1x8x64xf32>,
    return
  }
  func.func @transform_0(%arg0: i32) -> (i32, i32, i32, i32) {
    %c0_i32 = arith.constant 0 : i32
    %c0_i32_0 = arith.constant 0 : i32
    %c0_i32_1 = arith.constant 0 : i32
    %c0_i32_2 = arith.constant 0 : i32
    %c0_i32_3 = arith.constant 0 : i32
    return %c0_i32, %c0_i32_0, %c0_i32_1, %c0_i32_2 : i32, i32, i32, i32
  }
  func.func @transform_1(%arg0: i32) -> (i32, i32) {
    %c0_i32 = arith.constant 0 : i32
    %c0_i32_0 = arith.constant 0 : i32
    %c0_i32_1 = arith.constant 0 : i32
    return %c0_i32, %c0_i32_0 : i32, i32
  }
  func.func @transform_2(%arg0: i32) -> (i32, i32) {
    %c0_i32 = arith.constant 0 : i32
    %c0_i32_0 = arith.constant 0 : i32
    %c0_i32_1 = arith.constant 0 : i32
    return %c0_i32, %c0_i32_0 : i32, i32
  }
  func.func @transform_3(%arg0: i32) -> (i32, i32) {
    %c0_i32 = arith.constant 0 : i32
    %c0_i32_0 = arith.constant 0 : i32
    %c0_i32_1 = arith.constant 0 : i32
    return %c0_i32, %c0_i32_0 : i32, i32
  }
  func.func @transform_4(%arg0: i32) -> (i32, i32, i32) {
    %c0_i32 = arith.constant 0 : i32
    %c0_i32_0 = arith.constant 0 : i32
    %c0_i32_1 = arith.constant 0 : i32
    %c0_i32_2 = arith.constant 0 : i32
    return %c0_i32, %c0_i32_0, %c0_i32_1 : i32, i32, i32
  }
}

</mosaic_0001>

<bundles_post_ra>
// kernel: down_forward.1
= control target key start
LH: loop header
LB: loop body
LE: loop exit
PB: predicated region body
PF: predicated region fallthrough
CT: control target
= control target key end

     0   :  { %vm17_vm0 = vcmask 31744   ;;  %vm19_vm1 = vcmask 25600   ;;  %v1484_v0 = vmov 0.0   ;;  %s1485_s9 = smov 8   ;;  %s1486_s10 = smov 4   ;;  %vm971_vm2 = vcmask 1043456   ;;  %s2118_s0 = inlined_call_operand.vmem [shape: f32[2,8,8,4], index: 0, kind: input, shape index: {}]   ;;  %s2119_s1 = inlined_call_operand.vmem [shape: f32[36,8], index: 1, kind: input, shape index: {}]   ;;  %s2120_s2 = inlined_call_operand.vmem [shape: f32[1,8], index: 2, kind: input, shape index: {}]   ;;  %s2121_s3 = inlined_call_operand.vmem [shape: f32[1,8], index: 3, kind: input, shape index: {}]   ;;  %s2122_s4 = inlined_call_operand.vmem [shape: f32[2,8,64], index: 4, kind: output, shape index: {}]  }
   0x1   :  { %18 = vst.msk [vmem:[#allocation2] sm:$0xff] %vm17_vm0, %v1484_v0  ;;  %21 = vst.msk [vmem:[#allocation2 + $0x10] sm:$0xff] %vm17_vm0, %v1484_v0  ;;  %v59_v1 = vld [vmem:[%s2118_s0] sm:$0xff]  ;;  %v60_v2 = vld [vmem:[%s2118_s0 + $0x8] sm:$0xff]  ;;  %s1487_s11 = smov 12   ;;  %s1488_s14 = smov 16  }
   0x2   :  { %20 = vst.msk [vmem:[#allocation2 + $0x8] sm:$0x3] %vm19_vm1, %v1484_v0  ;;  %22 = vst.msk [vmem:[#allocation2 + $0x18] sm:$0x3] %vm19_vm1, %v1484_v0  ;;  %v61_v3 = vld [vmem:[%s2118_s0 + $0x10] sm:$0xff]  ;;  %v62_v4 = vld [vmem:[%s2118_s0 + $0x18] sm:$0xff] }
   0x3   :  { %23 = vst.msk [vmem:[#allocation2 + $0x20] sm:$0xff] %vm17_vm0, %v1484_v0  ;;  %25 = vst.msk [vmem:[#allocation2 + $0x30] sm:$0xff] %vm17_vm0, %v1484_v0  ;;  %v63_v5 = vld [vmem:[%s2118_s0 + $0x20] sm:$0xff]  ;;  %v64_v6 = vld [vmem:[%s2118_s0 + $0x28] sm:$0xff]  ;;  %s1489_s15 = smov 20   ;;  %s1490_s16 = smov 24  }
   0x4   :  { %24 = vst.msk [vmem:[#allocation2 + $0x28] sm:$0x3] %vm19_vm1, %v1484_v0  ;;  %26 = vst.msk [vmem:[#allocation2 + $0x38] sm:$0x3] %vm19_vm1, %v1484_v0  ;;  %v65_v7 = vld [vmem:[%s2118_s0 + $0x30] sm:$0xff]  ;;  %v66_v8 = vld [vmem:[%s2118_s0 + $0x38] sm:$0xff] }
   0x5   :  { %27 = vst.msk [vmem:[#allocation2 + $0x40] sm:$0xff] %vm17_vm0, %v1484_v0  ;;  %29 = vst.msk [vmem:[#allocation2 + $0x50] sm:$0xff] %vm17_vm0, %v1484_v0  ;;  %v67_v9 = vld [vmem:[%s2118_s0 + $0x40] sm:$0xff]  ;;  %v68_v10 = vld [vmem:[%s2118_s0 + $0x48] sm:$0xff]  ;;  %s1491_s23 = smov 28   ;;  %s1492_s28 = smov 32  }
   0x6   :  { %28 = vst.msk [vmem:[#allocation2 + $0x48] sm:$0x3] %vm19_vm1, %v1484_v0  ;;  %30 = vst.msk [vmem:[#allocation2 + $0x58] sm:$0x3] %vm19_vm1, %v1484_v0  ;;  %v69_v26 = vld [vmem:[%s2118_s0 + $0x50] sm:$0xff]  ;;  %v70_v31 = vld [vmem:[%s2118_s0 + $0x58] sm:$0xff] }
   0x7   :  { %31 = vst.msk [vmem:[#allocation2 + $0x60] sm:$0xff] %vm17_vm0, %v1484_v0  ;;  %33 = vst.msk [vmem:[#allocation2 + $0x70] sm:$0xff] %vm17_vm0, %v1484_v0  ;;  %v917_v32 = vld [vmem:[%s2119_s1] sm:$0xff]  ;;  %v918_v33 = vld [vmem:[%s2119_s1 + $0x8] sm:$0xff]  ;;  %vm204_vm3 = vcmask 64544   ;;  %vm301_vm4 = vcmask 97344  }
   0x8   :  { %32 = vst.msk [vmem:[#allocation2 + $0x68] sm:$0x3] %vm19_vm1, %v1484_v0  ;;  %34 = vst.msk [vmem:[#allocation2 + $0x78] sm:$0x3] %vm19_vm1, %v1484_v0  ;;  %v92_v22 = vld [vmem:[#allocation2] sm:$0xff]  ;;  %v1459_v34 = vpack.c.bf16 %v918_v33, %v917_v32  ;;  %v919_v35 = vld [vmem:[%s2119_s1 + $0x10] sm:$0xff] }
   0x9   :  { %35 = vst.msk [vmem:[#allocation2 + $0x80] sm:$0xff] %vm17_vm0, %v1484_v0  ;;  %37 = vst.msk [vmem:[#allocation2 + $0x90] sm:$0xff] %vm17_vm0, %v1484_v0  ;;  %v221_v11 = vld [vmem:[#allocation2 + $0x2] sm:$0xff]  ;;  %v920_v36 = vld [vmem:[%s2119_s1 + $0x18] sm:$0xff]  ;;  %vm398_vm5 = vcmask 130144   ;;  %vm495_vm6 = vcmask 162944  }
   0xa   :  { %36 = vst.msk [vmem:[#allocation2 + $0x88] sm:$0x3] %vm19_vm1, %v1484_v0  ;;  %38 = vst.msk [vmem:[#allocation2 + $0x98] sm:$0x3] %vm19_vm1, %v1484_v0  ;;  %v124_v12 = vld [vmem:[#allocation2 + $0x1] sm:$0xff]  ;;  %253 = vrot.lane.b32.xlu1 %v221_v11, %s1485_s9  ;;  %1460 = vmatprep.subr.bf16.mxu0 %v1459_v34  ;;  %v1463_v38 = vpack.c.bf16 %v920_v36, %v919_v35  ;;  %v73_v49 = vld [vmem:[%s2118_s0 + $0x70] sm:$0xff] }
   0xb   :  { %39 = vst.msk [vmem:[#allocation2 + $0xa0] sm:$0xff] %vm17_vm0, %v1484_v0  ;;  %41 = vst.msk [vmem:[#allocation2 + $0xb0] sm:$0xff] %vm17_vm0, %v1484_v0  ;;  %156 = vrot.lane.b32.xlu0 %v124_v12, %s1486_s10  ;;  %1467 = vmatprep.subr.bf16.mxu1 %v1459_v34  ;;  %v921_v39 = vld [vmem:[%s2119_s1 + $0x20] sm:$0xf]  ;;  %v72_v46 = vld [vmem:[%s2118_s0 + $0x68] sm:$0xff]  ;;  %vm592_vm7 = vcmask 195744  }
   0xc   :  { %40 = vst.msk [vmem:[#allocation2 + $0xa8] sm:$0x3] %vm19_vm1, %v1484_v0  ;;  %42 = vst.msk [vmem:[#allocation2 + $0xb8] sm:$0x3] %vm19_vm1, %v1484_v0  ;;  %1462 = vmatpush3.bf16.msra.mxu0 %v1459_v34  ;;  %1470 = vmatpush3.bf16.msra.mxu1 %v1459_v34  ;;  %v71_v41 = vld [vmem:[%s2118_s0 + $0x60] sm:$0xff]  ;;  %v74_v53 = vld [vmem:[%s2118_s0 + $0x78] sm:$0xff] }
   0xd   :  { %43 = vst.msk [vmem:[#allocation2 + $0xc0] sm:$0xff] %vm17_vm0, %v1484_v0  ;;  %45 = vst.msk [vmem:[#allocation2 + $0xd0] sm:$0xff] %vm17_vm0, %v1484_v0  ;;  %1464 = vmatprep.subr.bf16.mxu0 %v1463_v38  ;;  %1468 = vmatprep.subr.bf16.mxu1 %v1463_v38  ;;  %vm690_vm8 = vcmask 228544   ;;  %vm787_vm9 = vcmask 261344   ;;  %vm884_vm10 = vcmask 294144   ;;  %vm922_vm11 = vcmask 293888  }
   0xe   :  { %44 = vst.msk [vmem:[#allocation2 + $0xc8] sm:$0x3] %vm19_vm1, %v1484_v0  ;;  %46 = vst.msk [vmem:[#allocation2 + $0xd8] sm:$0x3] %vm19_vm1, %v1484_v0  ;;  %vm1120_vm12 = vcmask 64512  }
   0xf   :  { %47 = vst.msk [vmem:[#allocation2 + $0xe0] sm:$0xff] %vm17_vm0, %v1484_v0  ;;  %49 = vst.msk [vmem:[#allocation2 + $0xf0] sm:$0xff] %vm17_vm0, %v1484_v0 }
  0x10   :  { %48 = vst.msk [vmem:[#allocation2 + $0xe8] sm:$0x3] %vm19_vm1, %v1484_v0  ;;  %50 = vst.msk [vmem:[#allocation2 + $0xf8] sm:$0x3] %vm19_vm1, %v1484_v0  ;;  %1466 = vmatpush3.bf16.msra.mxu0 %v1463_v38  ;;  %1471 = vmatpush3.bf16.msra.mxu1 %v1463_v38 }
  0x11   :  { %51 = vst.msk [vmem:[#allocation2 + $0x100] sm:$0xff] %vm17_vm0, %v1484_v0  ;;  %53 = vst.msk [vmem:[#allocation2 + $0x110] sm:$0xff] %vm17_vm0, %v1484_v0  ;;  %1433 = vmatprep.subr.msk.mxu0 %vm971_vm2, %v921_v39  ;;  %1469 = vmatprep.subr.msk.mxu1 %vm971_vm2, %v921_v39 }
  0x12   :  { %52 = vst.msk [vmem:[#allocation2 + $0x108] sm:$0x3] %vm19_vm1, %v1484_v0  ;;  %54 = vst.msk [vmem:[#allocation2 + $0x118] sm:$0x3] %vm19_vm1, %v1484_v0  ;;  %v100_v55 = vld [vmem:[#allocation2 + $0xa0] sm:$0xff] }
  0x13   :  { %55 = vst.msk [vmem:[#allocation2 + $0x120] sm:$0xff] %vm17_vm0, %v1484_v0  ;;  %57 = vst.msk [vmem:[#allocation2 + $0x130] sm:$0xff] %vm17_vm0, %v1484_v0  ;;  %v132_v58 = vld [vmem:[#allocation2 + $0xa1] sm:$0xff] }
  0x14   :  { %56 = vst.msk [vmem:[#allocation2 + $0x128] sm:$0x3] %vm19_vm1, %v1484_v0  ;;  %58 = vst.msk [vmem:[#allocation2 + $0x138] sm:$0x3] %vm19_vm1, %v1484_v0  ;;  %1434 = vmatpush3.msk.msra.mxu0 %vm971_vm2, %v921_v39  ;;  %1472 = vmatpush3.msk.msra.mxu1 %vm971_vm2, %v921_v39  ;;  %v229_v59 = vld [vmem:[#allocation2 + $0xa2] sm:$0xff] }
  0x15   :  { %76 = vst.msk [vmem:[#allocation2 + $0x11] sm:$0xff] %vm17_vm0, %v59_v1  ;;  %77 = vst.msk [vmem:[#allocation2 + $0x21] sm:$0xff] %vm17_vm0, %v60_v2 }
  0x16   :  { %78 = vst.msk [vmem:[#allocation2 + $0x31] sm:$0xff] %vm17_vm0, %v61_v3  ;;  %79 = vst.msk [vmem:[#allocation2 + $0x41] sm:$0xff] %vm17_vm0, %v62_v4 }
  0x17   :  { %80 = vst.msk [vmem:[#allocation2 + $0x51] sm:$0xff] %vm17_vm0, %v63_v5  ;;  %81 = vst.msk [vmem:[#allocation2 + $0x61] sm:$0xff] %vm17_vm0, %v64_v6  ;;  %v617_v5 = vld [vmem:[#allocation2 + $0x90] sm:$0xff] }
  0x18   :  { %82 = vst.msk [vmem:[#allocation2 + $0x71] sm:$0xff] %vm17_vm0, %v65_v7  ;;  %83 = vst.msk [vmem:[#allocation2 + $0x81] sm:$0xff] %vm17_vm0, %v66_v8 }
  0x19   :  { %84 = vst.msk [vmem:[#allocation2 + $0xb1] sm:$0xff] %vm17_vm0, %v67_v9  ;;  %85 = vst.msk [vmem:[#allocation2 + $0xc1] sm:$0xff] %vm17_vm0, %v68_v10  ;;  %v714_v10 = vld [vmem:[#allocation2 + $0x91] sm:$0xff] }
  0x1a   :  { %108 = vst.msk [vmem:[#allocation3] sm:$0xff] %vm17_vm0, %v92_v22  ;;  %86 = vst.msk [vmem:[#allocation2 + $0xd1] sm:$0xff] %vm17_vm0, %v69_v26 }
  0x1b   :  { %87 = vst.msk [vmem:[#allocation2 + $0xe1] sm:$0xff] %vm17_vm0, %v70_v31  ;;  %88 = vst.msk [vmem:[#allocation2 + $0xf1] sm:$0xff] %vm17_vm0, %v71_v41 }
  0x1c   :  { %v319_v13 = vld [vmem:[#allocation2 + $0x20] sm:$0xff]  ;;  %v222_v14 = vld [vmem:[#allocation2 + $0x12] sm:$0xff]  ;;  %89 = vst.msk [vmem:[#allocation2 + $0x101] sm:$0xff] %vm17_vm0, %v72_v46  ;;  %90 = vst.msk [vmem:[#allocation2 + $0x111] sm:$0xff] %vm17_vm0, %v73_v49 }
  0x1d   :  { %v125_v15 = vld [vmem:[#allocation2 + $0x11] sm:$0xff]  ;;  %110 = vst.msk [vmem:[#allocation3 + $0x10] sm:$0xff] %vm17_vm0, %v319_v13  ;;  %v1602_v18 = vld [vmem:[#allocation2 + $0x40] sm:$0xff]  ;;  %255 = vrot.lane.b32.xlu1 %v222_v14, %s1485_s9  ;;  %91 = vst.msk [vmem:[#allocation2 + $0x121] sm:$0xff] %vm17_vm0, %v74_v53 }
  0x1e   :  { %v318_v16 = vld [vmem:[#allocation2 + $0x10] sm:$0xff]  ;;  %158 = vrot.lane.b32.xlu0 %v125_v15, %s1486_s10  ;;  %112 = vst.msk [vmem:[#allocation3 + $0x20] sm:$0xff] %vm17_vm0, %v1602_v18  ;;  %v1611_v20 = vld [vmem:[#allocation2 + $0x60] sm:$0xff]  ;;  %116 = vst.msk [vmem:[#allocation3 + $0x40] sm:$0xff] %vm17_vm0, %v100_v55 }
  0x1f   :  { %v320_v17 = vld [vmem:[#allocation2 + $0x30] sm:$0xff]  ;;  %109 = vst.msk [vmem:[#allocation3 + $0x8] sm:$0xff] %vm17_vm0, %v318_v16  ;;  %114 = vst.msk [vmem:[#allocation3 + $0x30] sm:$0xff] %vm17_vm0, %v1611_v20  ;;  %v126_v23 = vld [vmem:[#allocation2 + $0x21] sm:$0xff] }
  0x20   :  { %111 = vst.msk [vmem:[#allocation3 + $0x18] sm:$0xff] %vm17_vm0, %v320_v17  ;;  %v1607_v19 = vld [vmem:[#allocation2 + $0x50] sm:$0xff]  ;;  %v1626_v25 = vld [vmem:[#allocation2 + $0xc0] sm:$0xff] }
  0x21   :  { %113 = vst.msk [vmem:[#allocation3 + $0x28] sm:$0xff] %vm17_vm0, %v1607_v19  ;;  %v1615_v21 = vld [vmem:[#allocation2 + $0x70] sm:$0xff]  ;;  %352 = vrot.lane.b32.xlu1 %v319_v13, %s1487_s11  ;;  %118 = vst.msk [vmem:[#allocation3 + $0x50] sm:$0xff] %vm17_vm0, %v1626_v25  ;;  %v223_v27 = vld [vmem:[#allocation2 + $0x22] sm:$0xff] }
  0x22   :  { %115 = vst.msk [vmem:[#allocation3 + $0x38] sm:$0xff] %vm17_vm0, %v1615_v21  ;;  %350 = vrot.lane.b32.xlu0 %v318_v16, %s1487_s11  ;;  %v1624_v24 = vld [vmem:[#allocation2 + $0xb0] sm:$0xff]  ;;  %v1668_v37 = vld [vmem:[#allocation2 + $0xe0] sm:$0xff] }
  0x23   :  { %117 = vst.msk [vmem:[#allocation3 + $0x48] sm:$0xff] %vm17_vm0, %v1624_v24  ;;  %v127_v28 = vld [vmem:[#allocation2 + $0x31] sm:$0xff]  ;;  %120 = vst.msk [vmem:[#allocation3 + $0x60] sm:$0xff] %vm17_vm0, %v1668_v37  ;;  %v418_v40 = vld [vmem:[#allocation2 + $0x41] sm:$0xff] }
  0x24   :  { %v224_v29 = vld [vmem:[#allocation2 + $0x32] sm:$0xff]  ;;  %v225_v42 = vld [vmem:[#allocation2 + $0x42] sm:$0xff] }
  0x25   :  { %160 = vrot.lane.b32.xlu1 %v126_v23, %s1486_s10  ;;  %v1644_v30 = vld [vmem:[#allocation2 + $0xd0] sm:$0xff]  ;;  %v1707_v47 = vld [vmem:[#allocation2 + $0x100] sm:$0xff] }
  0x26   :  { %447 = vrot.lane.b32.xlu0 %v125_v15, %s1488_s14  ;;  %119 = vst.msk [vmem:[#allocation3 + $0x58] sm:$0xff] %vm17_vm0, %v1644_v30  ;;  %v129_v43 = vld [vmem:[#allocation2 + $0x51] sm:$0xff]  ;;  %122 = vst.msk [vmem:[#allocation3 + $0x70] sm:$0xff] %vm17_vm0, %v1707_v47  ;;  %v420_v48 = vld [vmem:[#allocation2 + $0x61] sm:$0xff] }
  0x27   :  { %v226_v44 = vld [vmem:[#allocation2 + $0x52] sm:$0xff]  ;;  %v227_v50 = vld [vmem:[#allocation2 + $0x62] sm:$0xff] }
  0x28   :  { %v1693_v45 = vld [vmem:[#allocation2 + $0xf0] sm:$0xff]  ;;  %v325_v56 = vld [vmem:[#allocation2 + $0x80] sm:$0xff] }
  0x29   :  { %544 = vrot.lane.b32.xlu1 %v222_v14, %s1489_s15  ;;  %121 = vst.msk [vmem:[#allocation3 + $0x68] sm:$0xff] %vm17_vm0, %v1693_v45  ;;  %v131_v51 = vld [vmem:[#allocation2 + $0x71] sm:$0xff]  ;;  %v422_v57 = vld [vmem:[#allocation2 + $0x81] sm:$0xff] }
  0x2a   :  { %449 = vrot.lane.b32.xlu0 %v126_v23, %s1488_s14  ;;  %v228_v52 = vld [vmem:[#allocation2 + $0x72] sm:$0xff]  ;;  %v519_v63 = vld [vmem:[#allocation2 + $0x82] sm:$0xff] }
  0x2b   :  { %v1735_v54 = vld [vmem:[#allocation2 + $0x110] sm:$0xff] }
  0x2c   :  { %123 = vst.msk [vmem:[#allocation3 + $0x78] sm:$0xff] %vm17_vm0, %v1735_v54  ;;  %v133_v60 = vld [vmem:[#allocation2 + $0xb1] sm:$0xff] }
  0x2d   :  { %257 = vrot.lane.b32.xlu1 %v223_v27, %s1485_s9  ;;  %v230_v2 = vld [vmem:[#allocation2 + $0xb2] sm:$0xff] }
  0x2e   :  { %162 = vrot.lane.b32.xlu0 %v127_v28, %s1486_s10  ;;  %v811_v16 = vld [vmem:[#allocation2 + $0x92] sm:$0xff] }
  0x2f   :  { %v232_v26 = vld [vmem:[#allocation2 + $0xd2] sm:$0xff] }
  0x31   :  { %642 = vrot.lane.b32.xlu1 %v319_v13, %s1490_s16  ;;  %v424_v13 = vld [vmem:[#allocation2 + $0xc1] sm:$0xff] }
  0x32   :  { %546 = vrot.lane.b32.xlu0 %v223_v27, %s1489_s15 }
  0x35   :  { %354 = vrot.lane.b32.xlu1 %v320_v17, %s1487_s11 }
  0x36   :  { %259 = vrot.lane.b32.xlu0 %v224_v29, %s1485_s9 }
  0x39   :  { %739 = vrot.lane.b32.xlu1 %v126_v23, %s1491_s23 }
  0x3a   :  { %644 = vrot.lane.b32.xlu0 %v320_v17, %s1490_s16 }
  0x3d   :  { %451 = vrot.lane.b32.xlu1 %v127_v28, %s1488_s14 }
  0x3e   :  { %356 = vrot.lane.b32.xlu0 %v1602_v18, %s1487_s11 }
  0x41   :  { %836 = vrot.lane.b32.xlu1 %v223_v27, %s1492_s28 }
  0x42   :  { %741 = vrot.lane.b32.xlu0 %v127_v28, %s1491_s23 }
  0x45   :  { %453 = vrot.lane.b32.xlu1 %v418_v40, %s1488_s14 }
  0x46   :  { %164 = vrot.lane.b32.xlu0 %v418_v40, %s1486_s10 }
  0x49   :  { %838 = vrot.lane.b32.xlu1 %v224_v29, %s1492_s28 }
  0x4a   :  { %548 = vrot.lane.b32.xlu0 %v224_v29, %s1489_s15 }
  0x4d   :  { %261 = vrot.lane.b32.xlu1 %v225_v42, %s1485_s9 }
  0x4e   :  { %166 = vrot.lane.b32.xlu0 %v129_v43, %s1486_s10 }
  0x51   :  { %646 = vrot.lane.b32.xlu1 %v1602_v18, %s1490_s16 }
  0x52   :  { %550 = vrot.lane.b32.xlu0 %v225_v42, %s1489_s15 }
  0x55   :  { %358 = vrot.lane.b32.xlu1 %v1607_v19, %s1487_s11 }
  0x56   :  { %263 = vrot.lane.b32.xlu0 %v226_v44, %s1485_s9 }
  0x59   :  { %743 = vrot.lane.b32.xlu1 %v418_v40, %s1491_s23 }
  0x5a   :  { %648 = vrot.lane.b32.xlu0 %v1607_v19, %s1490_s16  ;;  %v231_v19 = vld [vmem:[#allocation2 + $0xc2] sm:$0xff] }
  0x5d   :  { %455 = vrot.lane.b32.xlu1 %v129_v43, %s1488_s14 }
  0x5e   :  { %360 = vrot.lane.b32.xlu0 %v1611_v20, %s1487_s11 }
  0x61   :  { %840 = vrot.lane.b32.xlu1 %v225_v42, %s1492_s28  ;;  %v233_v42 = vld [vmem:[#allocation2 + $0xe2] sm:$0xff] }
  0x62   :  { %745 = vrot.lane.b32.xlu0 %v129_v43, %s1491_s23  ;;  %v137_v43 = vld [vmem:[#allocation2 + $0xf1] sm:$0xff] }
  0x65   :  { %457 = vrot.lane.b32.xlu1 %v420_v48, %s1488_s14 }
  0x66   :  { %168 = vrot.lane.b32.xlu0 %v420_v48, %s1486_s10 }
  0x69   :  { %842 = vrot.lane.b32.xlu1 %v226_v44, %s1492_s28 }
  0x6a   :  { %552 = vrot.lane.b32.xlu0 %v226_v44, %s1489_s15 }
  0x6d   :  { %265 = vrot.lane.b32.xlu1 %v227_v50, %s1485_s9 }
  0x6e   :  { %170 = vrot.lane.b32.xlu0 %v131_v51, %s1486_s10 }
  0x71   :  { %650 = vrot.lane.b32.xlu1 %v1611_v20, %s1490_s16  ;;  %v135_v20 = vld [vmem:[#allocation2 + $0xd1] sm:$0xff] }
  0x72   :  { %554 = vrot.lane.b32.xlu0 %v227_v50, %s1489_s15 }
  0x75   :  { %362 = vrot.lane.b32.xlu1 %v1615_v21, %s1487_s11 }
  0x76   :  { %267 = vrot.lane.b32.xlu0 %v228_v52, %s1485_s9 }
  0x79   :  { %747 = vrot.lane.b32.xlu1 %v420_v48, %s1491_s23 }
  0x7a   :  { %652 = vrot.lane.b32.xlu0 %v1615_v21, %s1490_s16 }
  0x7c   :  { %v254_v61 = vpop.permute.xlu1 %253 }
  0x7d   :  { %459 = vrot.lane.b32.xlu1 %v131_v51, %s1488_s14  ;;  %v157_v62 = vpop.permute.xlu0 %156 }
  0x7e   :  { %364 = vrot.lane.b32.xlu0 %v325_v56, %s1487_s11  ;;  %205 = vst.msk [vmem:[#allocation3] sm:$0xff] %vm204_vm3, %v157_v62 }
  0x7f   :  { %302 = vst.msk [vmem:[#allocation3] sm:$0xff] %vm301_vm4, %v254_v61 }
  0x81   :  { %844 = vrot.lane.b32.xlu1 %v227_v50, %s1492_s28  ;;  %v234_v50 = vld [vmem:[#allocation2 + $0xf2] sm:$0xff] }
  0x82   :  { %749 = vrot.lane.b32.xlu0 %v131_v51, %s1491_s23 }
  0x85   :  { %461 = vrot.lane.b32.xlu1 %v422_v57, %s1488_s14 }
  0x86   :  { %172 = vrot.lane.b32.xlu0 %v132_v58, %s1486_s10 }
  0x89   :  { %846 = vrot.lane.b32.xlu1 %v228_v52, %s1492_s28 }
  0x8a   :  { %556 = vrot.lane.b32.xlu0 %v228_v52, %s1489_s15 }
  0x8d   :  { %269 = vrot.lane.b32.xlu1 %v229_v59, %s1485_s9 }
  0x8e   :  { %174 = vrot.lane.b32.xlu0 %v133_v60, %s1486_s10 }
  0x8f   :  { %v256_v0 = vpop.permute.xlu1 %255 }
  0x90   :  { %v159_v1 = vpop.permute.xlu0 %158 }
  0x91   :  { %206 = vst.msk [vmem:[#allocation3 + $0x8] sm:$0xff] %vm204_vm3, %v159_v1  ;;  %654 = vrot.lane.b32.xlu1 %v325_v56, %s1490_s16  ;;  %v139_v1 = vld [vmem:[#allocation2 + $0x111] sm:$0xff] }
  0x92   :  { %558 = vrot.lane.b32.xlu0 %v519_v63, %s1489_s15  ;;  %303 = vst.msk [vmem:[#allocation3 + $0x8] sm:$0xff] %vm301_vm4, %v256_v0 }
  0x93   :  { %v353_v3 = vpop.permute.xlu1 %352 }
  0x94   :  { %v351_v4 = vpop.permute.xlu0 %350  ;;  %400 = vst.msk [vmem:[#allocation3 + $0x8] sm:$0xff] %vm398_vm5, %v353_v3 }
  0x95   :  { %399 = vst.msk [vmem:[#allocation3] sm:$0xff] %vm398_vm5, %v351_v4  ;;  %366 = vrot.lane.b32.xlu1 %v1624_v24, %s1487_s11 }
  0x96   :  { %271 = vrot.lane.b32.xlu0 %v230_v2, %s1485_s9 }
  0x97   :  { %v161_v6 = vpop.permute.xlu1 %160 }
  0x98   :  { %v448_v7 = vpop.permute.xlu0 %447  ;;  %207 = vst.msk [vmem:[#allocation3 + $0x10] sm:$0xff] %vm204_vm3, %v161_v6 }
  0x99   :  { %496 = vst.msk [vmem:[#allocation3] sm:$0xff] %vm495_vm6, %v448_v7  ;;  %751 = vrot.lane.b32.xlu1 %v422_v57, %s1491_s23  ;;  %v236_v7 = vld [vmem:[#allocation2 + $0x112] sm:$0xff] }
  0x9a   :  { %656 = vrot.lane.b32.xlu0 %v617_v5, %s1490_s16 }
  0x9b   :  { %v545_v8 = vpop.permute.xlu1 %544 }
  0x9c   :  { %v450_v9 = vpop.permute.xlu0 %449  ;;  %593 = vst.msk [vmem:[#allocation3] sm:$0xff] %vm592_vm7, %v545_v8 }
  0x9d   :  { %497 = vst.msk [vmem:[#allocation3 + $0x8] sm:$0xff] %vm495_vm6, %v450_v9  ;;  %463 = vrot.lane.b32.xlu1 %v133_v60, %s1488_s14 }
  0x9e   :  { %368 = vrot.lane.b32.xlu0 %v1626_v25, %s1487_s11 }
  0x9f   :  { %v258_v11 = vpop.permute.xlu1 %257 }
  0xa0   :  { %v163_v12 = vpop.permute.xlu0 %162  ;;  %304 = vst.msk [vmem:[#allocation3 + $0x10] sm:$0xff] %vm301_vm4, %v258_v11 }
  0xa1   :  { %208 = vst.msk [vmem:[#allocation3 + $0x18] sm:$0xff] %vm204_vm3, %v163_v12  ;;  %848 = vrot.lane.b32.xlu1 %v519_v63, %s1492_s28 }
  0xa2   :  { %753 = vrot.lane.b32.xlu0 %v714_v10, %s1491_s23 }
  0xa3   :  { %v643_v14 = vpop.permute.xlu1 %642 }
  0xa4   :  { %v547_v15 = vpop.permute.xlu0 %546  ;;  %691 = vst.msk [vmem:[#allocation3] sm:$0xff] %vm690_vm8, %v643_v14 }
  0xa5   :  { %594 = vst.msk [vmem:[#allocation3 + $0x8] sm:$0xff] %vm592_vm7, %v547_v15  ;;  %465 = vrot.lane.b32.xlu1 %v424_v13, %s1488_s14 }
  0xa6   :  { %176 = vrot.lane.b32.xlu0 %v424_v13, %s1486_s10 }
  0xa7   :  { %v355_v17 = vpop.permute.xlu1 %354 }
  0xa8   :  { %v260_v18 = vpop.permute.xlu0 %259  ;;  %401 = vst.msk [vmem:[#allocation3 + $0x10] sm:$0xff] %vm398_vm5, %v355_v17 }
  0xa9   :  { %305 = vst.msk [vmem:[#allocation3 + $0x18] sm:$0xff] %vm301_vm4, %v260_v18  ;;  %850 = vrot.lane.b32.xlu1 %v811_v16, %s1492_s28 }
  0xaa   :  { %560 = vrot.lane.b32.xlu0 %v230_v2, %s1489_s15  ;;  %v235_v2 = vld [vmem:[#allocation2 + $0x102] sm:$0xff] }
  0xab   :  { %v740_v21 = vpop.permute.xlu1 %739 }
  0xac   :  { %v645_v22 = vpop.permute.xlu0 %644  ;;  %788 = vst.msk [vmem:[#allocation3] sm:$0xff] %vm787_vm9, %v740_v21 }
  0xad   :  { %692 = vst.msk [vmem:[#allocation3 + $0x8] sm:$0xff] %vm690_vm8, %v645_v22  ;;  %273 = vrot.lane.b32.xlu1 %v231_v19, %s1485_s9 }
  0xae   :  { %178 = vrot.lane.b32.xlu0 %v135_v20, %s1486_s10 }
  0xaf   :  { %v452_v23 = vpop.permute.xlu1 %451 }
  0xb0   :  { %v357_v24 = vpop.permute.xlu0 %356  ;;  %498 = vst.msk [vmem:[#allocation3 + $0x10] sm:$0xff] %vm495_vm6, %v452_v23  ;;  %v625_v23 = vld [vmem:[#allocation2 + $0x130] sm:$0xff] }
  0xb1   :  { %402 = vst.msk [vmem:[#allocation3 + $0x18] sm:$0xff] %vm398_vm5, %v357_v24  ;;  %658 = vrot.lane.b32.xlu1 %v1626_v25, %s1490_s16 }
  0xb2   :  { %562 = vrot.lane.b32.xlu0 %v231_v19, %s1489_s15 }
  0xb3   :  { %v837_v27 = vpop.permute.xlu1 %836 }
  0xb4   :  { %v742_v28 = vpop.permute.xlu0 %741  ;;  %885 = vst.msk [vmem:[#allocation3] sm:$0xff] %vm884_vm10, %v837_v27  ;;  %v722_v27 = vld [vmem:[#allocation2 + $0x131] sm:$0xff] }
  0xb5   :  { %789 = vst.msk [vmem:[#allocation3 + $0x8] sm:$0xff] %vm787_vm9, %v742_v28  ;;  %370 = vrot.lane.b32.xlu1 %v1644_v30, %s1487_s11 }
  0xb6   :  { %275 = vrot.lane.b32.xlu0 %v232_v26, %s1485_s9 }
  0xb7   :  { %v454_v29 = vpop.permute.xlu1 %453 }
  0xb8   :  { %v165_v31 = vpop.permute.xlu0 %164  ;;  %499 = vst.msk [vmem:[#allocation3 + $0x18] sm:$0xff] %vm495_vm6, %v454_v29 }
  0xb9   :  { %209 = vst.msk [vmem:[#allocation3 + $0x20] sm:$0xff] %vm204_vm3, %v165_v31  ;;  %755 = vrot.lane.b32.xlu1 %v424_v13, %s1491_s23  ;;  %v819_v31 = vld [vmem:[#allocation2 + $0x132] sm:$0xff] }
  0xba   :  { %660 = vrot.lane.b32.xlu0 %v1644_v30, %s1490_s16  ;;  %v426_v30 = vld [vmem:[#allocation2 + $0xe1] sm:$0xff] }
  0xbb   :  { %v839_v25 = vpop.permute.xlu1 %838  ;;  %v901_v33 = vld [vmem:[#allocation3] sm:$0xff] }
  0xbc   :  { %v549_v32 = vpop.permute.xlu0 %548  ;;  %886 = vst.msk [vmem:[#allocation3 + $0x8] sm:$0xff] %vm884_vm10, %v839_v25  ;;  %1435 = vmatprep.mubr.msk.f32.mxu0 %vm922_vm11, %v901_v33 }
  0xbd   :  { %595 = vst.msk [vmem:[#allocation3 + $0x10] sm:$0xff] %vm592_vm7, %v549_v32  ;;  %467 = vrot.lane.b32.xlu1 %v135_v20, %s1488_s14 }
  0xbe   :  { %372 = vrot.lane.b32.xlu0 %v1668_v37, %s1487_s11 }
  0xbf   :  { %v262_v34 = vpop.permute.xlu1 %261 }
  0xc0   :  { %v167_v35 = vpop.permute.xlu0 %166  ;;  %306 = vst.msk [vmem:[#allocation3 + $0x20] sm:$0xff] %vm301_vm4, %v262_v34 }
  0xc1   :  { %210 = vst.msk [vmem:[#allocation3 + $0x28] sm:$0xff] %vm204_vm3, %v167_v35  ;;  %852 = vrot.lane.b32.xlu1 %v231_v19, %s1492_s28 }
  0xc2   :  { %757 = vrot.lane.b32.xlu0 %v135_v20, %s1491_s23  ;;  %v527_v20 = vld [vmem:[#allocation2 + $0x122] sm:$0xff] }
  0xc3   :  { %v647_v36 = vpop.permute.xlu1 %646  ;;  %v902_v39 = vld [vmem:[#allocation3 + $0x8] sm:$0xff] }
  0xc4   :  { %v551_v38 = vpop.permute.xlu0 %550  ;;  %693 = vst.msk [vmem:[#allocation3 + $0x10] sm:$0xff] %vm690_vm8, %v647_v36  ;;  %1436 = vmatmul.mubr.msk.f32.vlgmr.msra.gmra.mrb[0].mxu0 %vm922_vm11, %v902_v39 }
  0xc5   :  { %596 = vst.msk [vmem:[#allocation3 + $0x18] sm:$0xff] %vm592_vm7, %v551_v38  ;;  %469 = vrot.lane.b32.xlu1 %v426_v30, %s1488_s14 }
  0xc6   :  { %180 = vrot.lane.b32.xlu0 %v426_v30, %s1486_s10 }
  0xc7   :  { %v359_v40 = vpop.permute.xlu1 %358 }
  0xc8   :  { %v264_v41 = vpop.permute.xlu0 %263  ;;  %403 = vst.msk [vmem:[#allocation3 + $0x20] sm:$0xff] %vm398_vm5, %v359_v40 }
  0xc9   :  { %307 = vst.msk [vmem:[#allocation3 + $0x28] sm:$0xff] %vm301_vm4, %v264_v41  ;;  %854 = vrot.lane.b32.xlu1 %v232_v26, %s1492_s28 }
  0xca   :  { %564 = vrot.lane.b32.xlu0 %v232_v26, %s1489_s15 }
  0xcb   :  { %v744_v44 = vpop.permute.xlu1 %743 }
  0xcc   :  { %v649_v46 = vpop.permute.xlu0 %648  ;;  %790 = vst.msk [vmem:[#allocation3 + $0x10] sm:$0xff] %vm787_vm9, %v744_v44 }
  0xcd   :  { %694 = vst.msk [vmem:[#allocation3 + $0x18] sm:$0xff] %vm690_vm8, %v649_v46  ;;  %277 = vrot.lane.b32.xlu1 %v233_v42, %s1485_s9 }
  0xce   :  { %182 = vrot.lane.b32.xlu0 %v137_v43, %s1486_s10 }
  0xcf   :  { %v456_v48 = vpop.permute.xlu1 %455 }
  0xd0   :  { %v361_v49 = vpop.permute.xlu0 %360  ;;  %500 = vst.msk [vmem:[#allocation3 + $0x20] sm:$0xff] %vm495_vm6, %v456_v48 }
  0xd1   :  { %404 = vst.msk [vmem:[#allocation3 + $0x28] sm:$0xff] %vm398_vm5, %v361_v49  ;;  %662 = vrot.lane.b32.xlu1 %v1668_v37, %s1490_s16 }
  0xd2   :  { %566 = vrot.lane.b32.xlu0 %v233_v42, %s1489_s15 }
  0xd3   :  { %v841_v51 = vpop.permute.xlu1 %840 }
  0xd4   :  { %v746_v52 = vpop.permute.xlu0 %745  ;;  %887 = vst.msk [vmem:[#allocation3 + $0x10] sm:$0xff] %vm884_vm10, %v841_v51 }
  0xd5   :  { %791 = vst.msk [vmem:[#allocation3 + $0x18] sm:$0xff] %vm787_vm9, %v746_v52  ;;  %374 = vrot.lane.b32.xlu1 %v1693_v45, %s1487_s11 }
  0xd6   :  { %279 = vrot.lane.b32.xlu0 %v234_v50, %s1485_s9 }
  0xd7   :  { %v458_v53 = vpop.permute.xlu1 %457 }
  0xd8   :  { %v169_v55 = vpop.permute.xlu0 %168  ;;  %501 = vst.msk [vmem:[#allocation3 + $0x28] sm:$0xff] %vm495_vm6, %v458_v53 }
  0xd9   :  { %211 = vst.msk [vmem:[#allocation3 + $0x30] sm:$0xff] %vm204_vm3, %v169_v55  ;;  %759 = vrot.lane.b32.xlu1 %v426_v30, %s1491_s23 }
  0xda   :  { %664 = vrot.lane.b32.xlu0 %v1693_v45, %s1490_s16  ;;  %v428_v45 = vld [vmem:[#allocation2 + $0x101] sm:$0xff] }
  0xdb   :  { %v843_v37 = vpop.permute.xlu1 %842  ;;  %v903_v57 = vld [vmem:[#allocation3 + $0x10] sm:$0xff] }
  0xdc   :  { %v553_v56 = vpop.permute.xlu0 %552  ;;  %888 = vst.msk [vmem:[#allocation3 + $0x18] sm:$0xff] %vm884_vm10, %v843_v37  ;;  %1438 = vmatprep.mubr.msk.f32.mxu0 %vm922_vm11, %v903_v57 }
  0xdd   :  { %597 = vst.msk [vmem:[#allocation3 + $0x20] sm:$0xff] %vm592_vm7, %v553_v56  ;;  %471 = vrot.lane.b32.xlu1 %v137_v43, %s1488_s14 }
  0xde   :  { %376 = vrot.lane.b32.xlu0 %v1707_v47, %s1487_s11 }
  0xdf   :  { %v266_v58 = vpop.permute.xlu1 %265 }
  0xe0   :  { %v171_v59 = vpop.permute.xlu0 %170  ;;  %308 = vst.msk [vmem:[#allocation3 + $0x30] sm:$0xff] %vm301_vm4, %v266_v58 }
  0xe1   :  { %212 = vst.msk [vmem:[#allocation3 + $0x38] sm:$0xff] %vm204_vm3, %v171_v59  ;;  %856 = vrot.lane.b32.xlu1 %v233_v42, %s1492_s28 }
  0xe2   :  { %761 = vrot.lane.b32.xlu0 %v137_v43, %s1491_s23 }
  0xe3   :  { %v651_v60 = vpop.permute.xlu1 %650  ;;  %v904_v62 = vld [vmem:[#allocation3 + $0x18] sm:$0xff] }
  0xe4   :  { %v555_v61 = vpop.permute.xlu0 %554  ;;  %695 = vst.msk [vmem:[#allocation3 + $0x20] sm:$0xff] %vm690_vm8, %v651_v60  ;;  %1439 = vmatmul.mubr.msk.f32.gmra.mrb[2].mxu0 %vm922_vm11, %v904_v62 }
  0xe5   :  { %598 = vst.msk [vmem:[#allocation3 + $0x28] sm:$0xff] %vm592_vm7, %v555_v61  ;;  %473 = vrot.lane.b32.xlu1 %v428_v45, %s1488_s14 }
  0xe6   :  { %184 = vrot.lane.b32.xlu0 %v428_v45, %s1486_s10 }
  0xe7   :  { %v363_v63 = vpop.permute.xlu1 %362 }
  0xe8   :  { %v268_v0 = vpop.permute.xlu0 %267  ;;  %405 = vst.msk [vmem:[#allocation3 + $0x30] sm:$0xff] %vm398_vm5, %v363_v63 }
  0xe9   :  { %309 = vst.msk [vmem:[#allocation3 + $0x38] sm:$0xff] %vm301_vm4, %v268_v0  ;;  %858 = vrot.lane.b32.xlu1 %v234_v50, %s1492_s28 }
  0xea   :  { %568 = vrot.lane.b32.xlu0 %v234_v50, %s1489_s15 }
  0xeb   :  { %v748_v3 = vpop.permute.xlu1 %747 }
  0xec   :  { %v653_v4 = vpop.permute.xlu0 %652  ;;  %792 = vst.msk [vmem:[#allocation3 + $0x20] sm:$0xff] %vm787_vm9, %v748_v3 }
  0xed   :  { %696 = vst.msk [vmem:[#allocation3 + $0x28] sm:$0xff] %vm690_vm8, %v653_v4  ;;  %281 = vrot.lane.b32.xlu1 %v235_v2, %s1485_s9 }
  0xee   :  { %186 = vrot.lane.b32.xlu0 %v139_v1, %s1486_s10 }
  0xef   :  { %v460_v5 = vpop.permute.xlu1 %459 }
  0xf0   :  { %v365_v6 = vpop.permute.xlu0 %364  ;;  %502 = vst.msk [vmem:[#allocation3 + $0x30] sm:$0xff] %vm495_vm6, %v460_v5 }
  0xf1   :  { %406 = vst.msk [vmem:[#allocation3 + $0x38] sm:$0xff] %vm398_vm5, %v365_v6  ;;  %666 = vrot.lane.b32.xlu1 %v1707_v47, %s1490_s16  ;;  %v333_v47 = vld [vmem:[#allocation2 + $0x120] sm:$0xff] }
  0xf2   :  { %570 = vrot.lane.b32.xlu0 %v235_v2, %s1489_s15 }
  0xf3   :  { %v845_v8 = vpop.permute.xlu1 %844 }
  0xf4   :  { %v750_v9 = vpop.permute.xlu0 %749  ;;  %889 = vst.msk [vmem:[#allocation3 + $0x20] sm:$0xff] %vm884_vm10, %v845_v8 }
  0xf5   :  { %793 = vst.msk [vmem:[#allocation3 + $0x28] sm:$0xff] %vm787_vm9, %v750_v9  ;;  %378 = vrot.lane.b32.xlu1 %v1735_v54, %s1487_s11 }
  0xf6   :  { %283 = vrot.lane.b32.xlu0 %v236_v7, %s1485_s9 }
  0xf7   :  { %v462_v10 = vpop.permute.xlu1 %461 }
  0xf8   :  { %v173_v11 = vpop.permute.xlu0 %172  ;;  %503 = vst.msk [vmem:[#allocation3 + $0x38] sm:$0xff] %vm495_vm6, %v462_v10 }
  0xf9   :  { %213 = vst.msk [vmem:[#allocation3 + $0x40] sm:$0xff] %vm204_vm3, %v173_v11  ;;  %763 = vrot.lane.b32.xlu1 %v428_v45, %s1491_s23 }
  0xfa   :  { %668 = vrot.lane.b32.xlu0 %v1735_v54, %s1490_s16  ;;  %v430_v54 = vld [vmem:[#allocation2 + $0x121] sm:$0xff] }
  0xfb   :  { %v847_v12 = vpop.permute.xlu1 %846  ;;  %v905_v14 = vld [vmem:[#allocation3 + $0x20] sm:$0xff] }
  0xfc   :  { %v557_v13 = vpop.permute.xlu0 %556  ;;  %890 = vst.msk [vmem:[#allocation3 + $0x28] sm:$0xff] %vm884_vm10, %v847_v12  ;;  %1441 = vmatprep.mubr.msk.f32.mxu0 %vm922_vm11, %v905_v14 }
  0xfd   :  { %599 = vst.msk [vmem:[#allocation3 + $0x30] sm:$0xff] %vm592_vm7, %v557_v13  ;;  %475 = vrot.lane.b32.xlu1 %v139_v1, %s1488_s14 }
  0xfe   :  { %380 = vrot.lane.b32.xlu0 %v333_v47, %s1487_s11 }
  0xff   :  { %v270_v15 = vpop.permute.xlu1 %269 }
 0x100   :  { %v175_v16 = vpop.permute.xlu0 %174  ;;  %310 = vst.msk [vmem:[#allocation3 + $0x40] sm:$0xff] %vm301_vm4, %v270_v15 }
 0x101   :  { %214 = vst.msk [vmem:[#allocation3 + $0x48] sm:$0xff] %vm204_vm3, %v175_v16  ;;  %860 = vrot.lane.b32.xlu1 %v235_v2, %s1492_s28 }
 0x102   :  { %765 = vrot.lane.b32.xlu0 %v139_v1, %s1491_s23 }
 0x103   :  { %v655_v17 = vpop.permute.xlu1 %654  ;;  %v906_v19 = vld [vmem:[#allocation3 + $0x28] sm:$0xff] }
 0x104   :  { %v559_v18 = vpop.permute.xlu0 %558  ;;  %697 = vst.msk [vmem:[#allocation3 + $0x30] sm:$0xff] %vm690_vm8, %v655_v17  ;;  %1442 = vmatmul.mubr.msk.f32.gmra.mrb[4].mxu0 %vm922_vm11, %v906_v19 }
 0x105   :  { %600 = vst.msk [vmem:[#allocation3 + $0x38] sm:$0xff] %vm592_vm7, %v559_v18  ;;  %572 = vrot.lane.b32.xlu1 %v236_v7, %s1489_s15 }
 0x106   :  { %477 = vrot.lane.b32.xlu0 %v430_v54, %s1488_s14 }
 0x107   :  { %v367_v21 = vpop.permute.xlu1 %366 }
 0x108   :  { %v272_v22 = vpop.permute.xlu0 %271  ;;  %407 = vst.msk [vmem:[#allocation3 + $0x40] sm:$0xff] %vm398_vm5, %v367_v21 }
 0x109   :  { %311 = vst.msk [vmem:[#allocation3 + $0x48] sm:$0xff] %vm301_vm4, %v272_v22  ;;  %574 = vrot.lane.b32.xlu1 %v527_v20, %s1489_s15 }
 0x10a   :  { %862 = vrot.lane.b32.xlu0 %v236_v7, %s1492_s28 }
 0x10b   :  { %v752_v24 = vpop.permute.xlu1 %751 }
 0x10c   :  { %v657_v26 = vpop.permute.xlu0 %656  ;;  %794 = vst.msk [vmem:[#allocation3 + $0x30] sm:$0xff] %vm787_vm9, %v752_v24 }
 0x10d   :  { %698 = vst.msk [vmem:[#allocation3 + $0x38] sm:$0xff] %vm690_vm8, %v657_v26  ;;  %672 = vrot.lane.b32.xlu1 %v625_v23, %s1490_s16 }
 0x10e   :  { %670 = vrot.lane.b32.xlu0 %v333_v47, %s1490_s16 }
 0x10f   :  { %v464_v28 = vpop.permute.xlu1 %463 }
 0x110   :  { %v369_v29 = vpop.permute.xlu0 %368  ;;  %504 = vst.msk [vmem:[#allocation3 + $0x40] sm:$0xff] %vm495_vm6, %v464_v28 }
 0x111   :  { %408 = vst.msk [vmem:[#allocation3 + $0x48] sm:$0xff] %vm398_vm5, %v369_v29  ;;  %769 = vrot.lane.b32.xlu1 %v722_v27, %s1491_s23 }
 0x112   :  { %767 = vrot.lane.b32.xlu0 %v430_v54, %s1491_s23 }
 0x113   :  { %v849_v25 = vpop.permute.xlu1 %848 }
 0x114   :  { %v754_v32 = vpop.permute.xlu0 %753  ;;  %891 = vst.msk [vmem:[#allocation3 + $0x30] sm:$0xff] %vm884_vm10, %v849_v25 }
 0x115   :  { %795 = vst.msk [vmem:[#allocation3 + $0x38] sm:$0xff] %vm787_vm9, %v754_v32  ;;  %866 = vrot.lane.b32.xlu1 %v819_v31, %s1492_s28 }
 0x116   :  { %864 = vrot.lane.b32.xlu0 %v527_v20, %s1492_s28 }
 0x117   :  { %v466_v33 = vpop.permute.xlu1 %465 }
 0x118   :  { %v177_v34 = vpop.permute.xlu0 %176  ;;  %505 = vst.msk [vmem:[#allocation3 + $0x48] sm:$0xff] %vm495_vm6, %v466_v33 }
 0x119   :  { %215 = vst.msk [vmem:[#allocation3 + $0x50] sm:$0xff] %vm204_vm3, %v177_v34 }
 0x11b   :  { %v851_v35 = vpop.permute.xlu1 %850  ;;  %v907_v36 = vld [vmem:[#allocation3 + $0x30] sm:$0xff] }
 0x11c   :  { %v561_v30 = vpop.permute.xlu0 %560  ;;  %892 = vst.msk [vmem:[#allocation3 + $0x38] sm:$0xff] %vm884_vm10, %v851_v35  ;;  %1444 = vmatprep.mubr.msk.f32.mxu0 %vm922_vm11, %v907_v36 }
 0x11d   :  { %601 = vst.msk [vmem:[#allocation3 + $0x40] sm:$0xff] %vm592_vm7, %v561_v30 }
 0x11f   :  { %v274_v38 = vpop.permute.xlu1 %273 }
 0x120   :  { %v179_v39 = vpop.permute.xlu0 %178  ;;  %312 = vst.msk [vmem:[#allocation3 + $0x50] sm:$0xff] %vm301_vm4, %v274_v38 }
 0x121   :  { %216 = vst.msk [vmem:[#allocation3 + $0x58] sm:$0xff] %vm204_vm3, %v179_v39 }
 0x123   :  { %v659_v40 = vpop.permute.xlu1 %658  ;;  %v908_v42 = vld [vmem:[#allocation3 + $0x38] sm:$0xff] }
 0x124   :  { %v563_v41 = vpop.permute.xlu0 %562  ;;  %699 = vst.msk [vmem:[#allocation3 + $0x40] sm:$0xff] %vm690_vm8, %v659_v40  ;;  %1445 = vmatmul.mubr.msk.f32.gmra.mrb[6].mxu0 %vm922_vm11, %v908_v42 }
 0x125   :  { %602 = vst.msk [vmem:[#allocation3 + $0x48] sm:$0xff] %vm592_vm7, %v563_v41 }
 0x127   :  { %v371_v43 = vpop.permute.xlu1 %370 }
 0x128   :  { %v276_v44 = vpop.permute.xlu0 %275  ;;  %409 = vst.msk [vmem:[#allocation3 + $0x50] sm:$0xff] %vm398_vm5, %v371_v43 }
 0x129   :  { %313 = vst.msk [vmem:[#allocation3 + $0x58] sm:$0xff] %vm301_vm4, %v276_v44 }
 0x12b   :  { %v756_v46 = vpop.permute.xlu1 %755 }
 0x12c   :  { %v661_v48 = vpop.permute.xlu0 %660  ;;  %796 = vst.msk [vmem:[#allocation3 + $0x40] sm:$0xff] %vm787_vm9, %v756_v46 }
 0x12d   :  { %700 = vst.msk [vmem:[#allocation3 + $0x48] sm:$0xff] %vm690_vm8, %v661_v48 }
 0x12f   :  { %v468_v49 = vpop.permute.xlu1 %467 }
 0x130   :  { %v373_v50 = vpop.permute.xlu0 %372  ;;  %506 = vst.msk [vmem:[#allocation3 + $0x50] sm:$0xff] %vm495_vm6, %v468_v49 }
 0x131   :  { %410 = vst.msk [vmem:[#allocation3 + $0x58] sm:$0xff] %vm398_vm5, %v373_v50 }
 0x133   :  { %v853_v51 = vpop.permute.xlu1 %852 }
 0x134   :  { %v758_v52 = vpop.permute.xlu0 %757  ;;  %893 = vst.msk [vmem:[#allocation3 + $0x40] sm:$0xff] %vm884_vm10, %v853_v51 }
 0x135   :  { %797 = vst.msk [vmem:[#allocation3 + $0x48] sm:$0xff] %vm787_vm9, %v758_v52 }
 0x137   :  { %v470_v53 = vpop.permute.xlu1 %469 }
 0x138   :  { %v181_v55 = vpop.permute.xlu0 %180  ;;  %507 = vst.msk [vmem:[#allocation3 + $0x58] sm:$0xff] %vm495_vm6, %v470_v53 }
 0x139   :  { %217 = vst.msk [vmem:[#allocation3 + $0x60] sm:$0xff] %vm204_vm3, %v181_v55 }
 0x13b   :  { %v855_v37 = vpop.permute.xlu1 %854  ;;  %v909_v57 = vld [vmem:[#allocation3 + $0x40] sm:$0xff] }
 0x13c   :  { %v565_v56 = vpop.permute.xlu0 %564  ;;  %894 = vst.msk [vmem:[#allocation3 + $0x48] sm:$0xff] %vm884_vm10, %v855_v37  ;;  %1447 = vmatprep.mubr.msk.f32.mxu1 %vm922_vm11, %v909_v57 }
 0x13d   :  { %603 = vst.msk [vmem:[#allocation3 + $0x50] sm:$0xff] %vm592_vm7, %v565_v56 }
 0x13f   :  { %v278_v58 = vpop.permute.xlu1 %277 }
 0x140   :  { %v183_v59 = vpop.permute.xlu0 %182  ;;  %314 = vst.msk [vmem:[#allocation3 + $0x60] sm:$0xff] %vm301_vm4, %v278_v58 }
 0x141   :  { %218 = vst.msk [vmem:[#allocation3 + $0x68] sm:$0xff] %vm204_vm3, %v183_v59 }
 0x143   :  { %v663_v45 = vpop.permute.xlu1 %662  ;;  %v910_v61 = vld [vmem:[#allocation3 + $0x48] sm:$0xff] }
 0x144   :  { %v567_v60 = vpop.permute.xlu0 %566  ;;  %701 = vst.msk [vmem:[#allocation3 + $0x50] sm:$0xff] %vm690_vm8, %v663_v45  ;;  %1448 = vmatmul.mubr.msk.f32.vlgmr.msra.gmra.mrb[0].mxu1 %vm922_vm11, %v910_v61 }
 0x145   :  { %604 = vst.msk [vmem:[#allocation3 + $0x58] sm:$0xff] %vm592_vm7, %v567_v60 }
 0x147   :  { %v375_v62 = vpop.permute.xlu1 %374 }
 0x148   :  { %v280_v63 = vpop.permute.xlu0 %279  ;;  %411 = vst.msk [vmem:[#allocation3 + $0x60] sm:$0xff] %vm398_vm5, %v375_v62 }
 0x149   :  { %315 = vst.msk [vmem:[#allocation3 + $0x68] sm:$0xff] %vm301_vm4, %v280_v63 }
 0x14b   :  { %v760_v0 = vpop.permute.xlu1 %759 }
 0x14c   :  { %v665_v1 = vpop.permute.xlu0 %664  ;;  %798 = vst.msk [vmem:[#allocation3 + $0x50] sm:$0xff] %vm787_vm9, %v760_v0 }
 0x14d   :  { %702 = vst.msk [vmem:[#allocation3 + $0x58] sm:$0xff] %vm690_vm8, %v665_v1 }
 0x14f   :  { %v472_v2 = vpop.permute.xlu1 %471 }
 0x150   :  { %v377_v3 = vpop.permute.xlu0 %376  ;;  %508 = vst.msk [vmem:[#allocation3 + $0x60] sm:$0xff] %vm495_vm6, %v472_v2 }
 0x151   :  { %412 = vst.msk [vmem:[#allocation3 + $0x68] sm:$0xff] %vm398_vm5, %v377_v3 }
 0x153   :  { %v857_v4 = vpop.permute.xlu1 %856 }
 0x154   :  { %v762_v5 = vpop.permute.xlu0 %761  ;;  %895 = vst.msk [vmem:[#allocation3 + $0x50] sm:$0xff] %vm884_vm10, %v857_v4 }
 0x155   :  { %799 = vst.msk [vmem:[#allocation3 + $0x58] sm:$0xff] %vm787_vm9, %v762_v5 }
 0x157   :  { %v474_v6 = vpop.permute.xlu1 %473 }
 0x158   :  { %v185_v7 = vpop.permute.xlu0 %184  ;;  %509 = vst.msk [vmem:[#allocation3 + $0x68] sm:$0xff] %vm495_vm6, %v474_v6 }
 0x159   :  { %219 = vst.msk [vmem:[#allocation3 + $0x70] sm:$0xff] %vm204_vm3, %v185_v7 }
 0x15b   :  { %v859_v8 = vpop.permute.xlu1 %858  ;;  %v911_v10 = vld [vmem:[#allocation3 + $0x50] sm:$0xff] }
 0x15c   :  { %v569_v9 = vpop.permute.xlu0 %568  ;;  %896 = vst.msk [vmem:[#allocation3 + $0x58] sm:$0xff] %vm884_vm10, %v859_v8  ;;  %1450 = vmatprep.mubr.msk.f32.mxu1 %vm922_vm11, %v911_v10 }
 0x15d   :  { %605 = vst.msk [vmem:[#allocation3 + $0x60] sm:$0xff] %vm592_vm7, %v569_v9 }
 0x15f   :  { %v282_v47 = vpop.permute.xlu1 %281 }
 0x160   :  { %v187_v11 = vpop.permute.xlu0 %186  ;;  %316 = vst.msk [vmem:[#allocation3 + $0x70] sm:$0xff] %vm301_vm4, %v282_v47 }
 0x161   :  { %220 = vst.msk [vmem:[#allocation3 + $0x78] sm:$0xff] %vm204_vm3, %v187_v11 }
 0x163   :  { %v667_v13 = vpop.permute.xlu1 %666  ;;  %v912_v14 = vld [vmem:[#allocation3 + $0x58] sm:$0xff] }
 0x164   :  { %v571_v12 = vpop.permute.xlu0 %570  ;;  %703 = vst.msk [vmem:[#allocation3 + $0x60] sm:$0xff] %vm690_vm8, %v667_v13  ;;  %1451 = vmatmul.mubr.msk.f32.gmra.mrb[2].mxu1 %vm922_vm11, %v912_v14 }
 0x165   :  { %606 = vst.msk [vmem:[#allocation3 + $0x68] sm:$0xff] %vm592_vm7, %v571_v12 }
 0x167   :  { %v379_v16 = vpop.permute.xlu1 %378 }
 0x168   :  { %v284_v15 = vpop.permute.xlu0 %283  ;;  %413 = vst.msk [vmem:[#allocation3 + $0x70] sm:$0xff] %vm398_vm5, %v379_v16 }
 0x169   :  { %317 = vst.msk [vmem:[#allocation3 + $0x78] sm:$0xff] %vm301_vm4, %v284_v15 }
 0x16b   :  { %v764_v17 = vpop.permute.xlu1 %763 }
 0x16c   :  { %v669_v54 = vpop.permute.xlu0 %668  ;;  %800 = vst.msk [vmem:[#allocation3 + $0x60] sm:$0xff] %vm787_vm9, %v764_v17 }
 0x16d   :  { %704 = vst.msk [vmem:[#allocation3 + $0x68] sm:$0xff] %vm690_vm8, %v669_v54 }
 0x16f   :  { %v476_v19 = vpop.permute.xlu1 %475 }
 0x170   :  { %v381_v18 = vpop.permute.xlu0 %380  ;;  %510 = vst.msk [vmem:[#allocation3 + $0x70] sm:$0xff] %vm495_vm6, %v476_v19 }
 0x171   :  { %414 = vst.msk [vmem:[#allocation3 + $0x78] sm:$0xff] %vm398_vm5, %v381_v18 }
 0x173   :  { %v861_v21 = vpop.permute.xlu1 %860 }
 0x174   :  { %v766_v20 = vpop.permute.xlu0 %765  ;;  %897 = vst.msk [vmem:[#allocation3 + $0x60] sm:$0xff] %vm884_vm10, %v861_v21 }
 0x175   :  { %801 = vst.msk [vmem:[#allocation3 + $0x68] sm:$0xff] %vm787_vm9, %v766_v20 }
 0x177   :  { %v573_v23 = vpop.permute.xlu1 %572 }
 0x178   :  { %v478_v22 = vpop.permute.xlu0 %477  ;;  %607 = vst.msk [vmem:[#allocation3 + $0x70] sm:$0xff] %vm592_vm7, %v573_v23 }
 0x179   :  { %511 = vst.msk [vmem:[#allocation3 + $0x78] sm:$0xff] %vm495_vm6, %v478_v22 }
 0x17b   :  { %v575_v26 = vpop.permute.xlu1 %574  ;;  %v913_v27 = vld [vmem:[#allocation3 + $0x60] sm:$0xff] }
 0x17c   :  { %v863_v24 = vpop.permute.xlu0 %862  ;;  %608 = vst.msk [vmem:[#allocation3 + $0x78] sm:$0xff] %vm592_vm7, %v575_v26  ;;  %1453 = vmatprep.mubr.msk.f32.mxu1 %vm922_vm11, %v913_v27 }
 0x17d   :  { %898 = vst.msk [vmem:[#allocation3 + $0x68] sm:$0xff] %vm884_vm10, %v863_v24 }
 0x17f   :  { %v673_v29 = vpop.permute.xlu1 %672 }
 0x180   :  { %v671_v28 = vpop.permute.xlu0 %670  ;;  %706 = vst.msk [vmem:[#allocation3 + $0x78] sm:$0xff] %vm690_vm8, %v673_v29 }
 0x181   :  { %705 = vst.msk [vmem:[#allocation3 + $0x70] sm:$0xff] %vm690_vm8, %v671_v28 }
 0x183   :  { %v770_v25 = vpop.permute.xlu1 %769 }
 0x184   :  { %v768_v31 = vpop.permute.xlu0 %767  ;;  %v914_v32 = vld [vmem:[#allocation3 + $0x68] sm:$0xff]  ;;  %803 = vst.msk [vmem:[#allocation3 + $0x78] sm:$0xff] %vm787_vm9, %v770_v25 }
 0x185   :  { %802 = vst.msk [vmem:[#allocation3 + $0x70] sm:$0xff] %vm787_vm9, %v768_v31  ;;  %1454 = vmatmul.mubr.msk.f32.gmra.mrb[4].mxu1 %vm922_vm11, %v914_v32 }
 0x187   :  { %v867_v34 = vpop.permute.xlu1 %866 }
 0x188   :  { %v865_v33 = vpop.permute.xlu0 %864  ;;  %900 = vst.msk [vmem:[#allocation3 + $0x78] sm:$0xff] %vm884_vm10, %v867_v34 }
 0x189   :  { %899 = vst.msk [vmem:[#allocation3 + $0x70] sm:$0xff] %vm884_vm10, %v865_v33 }
 0x18f   :  { %v916_v30 = vld [vmem:[#allocation3 + $0x78] sm:$0xff] }
 0x190   :  { %v915_v35 = vld [vmem:[#allocation3 + $0x70] sm:$0xff] }
 0x191   :  { %1456 = vmatprep.mubr.msk.f32.mxu1 %vm922_vm11, %v915_v35 }
 0x192   :  { %1457 = vmatmul.mubr.msk.f32.gmra.mrb[6].mxu1 %vm922_vm11, %v916_v30 }
 0x197   :  { %v1979_v36 = vpop.f32.mrb[0].mxu0 }
 0x198   :  { %v1122_v38 = vsel %vm1120_vm12, %v1979_v36, 0.0  ;;  %v1160_v39 = vmul.f32 %v1979_v36, %v1979_v36  ;;  %v1985_v40 = vpop.f32.mrb[1].mxu0 }
 0x199   :  { %v1121_v41 = vsel %vm1120_vm12, %v1985_v40, 0.0  ;;  %v1159_v42 = vmul.f32 %v1985_v40, %v1985_v40 }
 0x19a   :  { %v1176_v43 = vsel %vm1120_vm12, %v1160_v39, 0.0  ;;  %v1123_v44 = vadd.f32 %v1122_v38, %v1121_v41 }
 0x19b   :  { %v1175_v46 = vsel %vm1120_vm12, %v1159_v42, 0.0 }
 0x19c   :  { %v1177_v48 = vadd.f32 %v1176_v43, %v1175_v46 }
 0x1b7   :  { %v1993_v49 = vpop.f32.mrb[2].mxu0 }
 0x1b8   :  { %v1995_v50 = vpop.f32.mrb[3].mxu0  ;;  %v1162_v51 = vmul.f32 %v1993_v49, %v1993_v49  ;;  %v1126_v37 = vsel %vm1120_vm12, %v1993_v49, 0.0 }
 0x1b9   :  { %v1124_v52 = vsel %vm1120_vm12, %v1995_v50, 0.0  ;;  %v1161_v53 = vmul.f32 %v1995_v50, %v1995_v50 }
 0x1ba   :  { %v1125_v55 = vadd.f32 %v1124_v52, %v1123_v44  ;;  %v1180_v59 = vsel %vm1120_vm12, %v1162_v51, 0.0 }
 0x1bb   :  { %v1178_v56 = vsel %vm1120_vm12, %v1161_v53, 0.0 }
 0x1bc   :  { %v1179_v57 = vadd.f32 %v1178_v56, %v1177_v48  ;;  %v1127_v58 = vadd.f32 %v1126_v37, %v1125_v55 }
 0x1be   :  { %v1181_v45 = vadd.f32 %v1180_v59, %v1179_v57 }
 0x1d7   :  { %v2007_v60 = vpop.f32.mrb[4].mxu0 }
 0x1d8   :  { %v2009_v61 = vpop.f32.mrb[5].mxu0  ;;  %v1164_v62 = vmul.f32 %v2007_v60, %v2007_v60  ;;  %v1130_v2 = vsel %vm1120_vm12, %v2007_v60, 0.0 }
 0x1d9   :  { %v1128_v63 = vsel %vm1120_vm12, %v2009_v61, 0.0  ;;  %v1163_v0 = vmul.f32 %v2009_v61, %v2009_v61 }
 0x1da   :  { %v1129_v1 = vadd.f32 %v1128_v63, %v1127_v58  ;;  %v1184_v6 = vsel %vm1120_vm12, %v1164_v62, 0.0 }
 0x1db   :  { %v1182_v3 = vsel %vm1120_vm12, %v1163_v0, 0.0 }
 0x1dc   :  { %v1183_v4 = vadd.f32 %v1182_v3, %v1181_v45  ;;  %v1131_v5 = vadd.f32 %v1130_v2, %v1129_v1 }
 0x1de   :  { %v1185_v7 = vadd.f32 %v1184_v6, %v1183_v4 }
 0x1f7   :  { %v2021_v8 = vpop.f32.mrb[6].mxu0 }
 0x1f8   :  { %v2023_v9 = vpop.f32.mrb[7].mxu0  ;;  %v1166_v10 = vmul.f32 %v2021_v8, %v2021_v8  ;;  %v1134_v13 = vsel %vm1120_vm12, %v2021_v8, 0.0 }
 0x1f9   :  { %v1132_v11 = vsel %vm1120_vm12, %v2023_v9, 0.0  ;;  %v1165_v47 = vmul.f32 %v2023_v9, %v2023_v9 }
 0x1fa   :  { %v1133_v12 = vadd.f32 %v1132_v11, %v1131_v5  ;;  %v1188_v54 = vsel %vm1120_vm12, %v1166_v10, 0.0 }
 0x1fb   :  { %v1186_v14 = vsel %vm1120_vm12, %v1165_v47, 0.0 }
 0x1fc   :  { %v1135_v15 = vadd.f32 %v1134_v13, %v1133_v12  ;;  %v1187_v16 = vadd.f32 %v1186_v14, %v1185_v7 }
 0x1fe   :  { %v1189_v17 = vadd.f32 %v1188_v54, %v1187_v16 }
 0x217   :  { %v2035_v18 = vpop.f32.mrb[0].mxu1 }
 0x218   :  { %v2037_v19 = vpop.f32.mrb[1].mxu1  ;;  %v1168_v20 = vmul.f32 %v2035_v18, %v2035_v18  ;;  %v1138_v24 = vsel %vm1120_vm12, %v2035_v18, 0.0 }
 0x219   :  { %v1136_v21 = vsel %vm1120_vm12, %v2037_v19, 0.0  ;;  %v1167_v22 = vmul.f32 %v2037_v19, %v2037_v19 }
 0x21a   :  { %v1137_v23 = vadd.f32 %v1136_v21, %v1135_v15  ;;  %v1192_v29 = vsel %vm1120_vm12, %v1168_v20, 0.0 }
 0x21b   :  { %v1190_v26 = vsel %vm1120_vm12, %v1167_v22, 0.0 }
 0x21c   :  { %v1191_v27 = vadd.f32 %v1190_v26, %v1189_v17  ;;  %v1139_v28 = vadd.f32 %v1138_v24, %v1137_v23 }
 0x21e   :  { %v1193_v31 = vadd.f32 %v1192_v29, %v1191_v27 }
 0x237   :  { %v2049_v25 = vpop.f32.mrb[2].mxu1 }
 0x238   :  { %v2051_v32 = vpop.f32.mrb[3].mxu1  ;;  %v1170_v33 = vmul.f32 %v2049_v25, %v2049_v25  ;;  %v1142_v38 = vsel %vm1120_vm12, %v2049_v25, 0.0 }
 0x239   :  { %v1140_v34 = vsel %vm1120_vm12, %v2051_v32, 0.0  ;;  %v1169_v35 = vmul.f32 %v2051_v32, %v2051_v32 }
 0x23a   :  { %v1141_v30 = vadd.f32 %v1140_v34, %v1139_v28  ;;  %v1196_v43 = vsel %vm1120_vm12, %v1170_v33, 0.0  ;;  %v1215_v34 = vld [vmem:[%s2120_s2] sm:$0x1] }
 0x23b   :  { %v1194_v39 = vsel %vm1120_vm12, %v1169_v35, 0.0 }
 0x23c   :  { %v1195_v41 = vadd.f32 %v1194_v39, %v1193_v31  ;;  %v1143_v42 = vadd.f32 %v1142_v38, %v1141_v30  ;;  %v1223_v31 = vlaneseq  ;;  %v1219_v39 = vld [vmem:[%s2121_s3] sm:$0x1] }
 0x23e   :  { %v1197_v44 = vadd.f32 %v1196_v43, %v1195_v41  ;;  %v1224_v33 = vshrl.u32 %v1223_v31, 7 }
 0x240   :  { %v1225_v35 = vsub.s32 0, %v1224_v33 }
 0x258   :  { %v2063_v46 = vpop.f32.mrb[4].mxu1 }
 0x259   :  { %v2065_v48 = vpop.f32.mrb[5].mxu1  ;;  %v1172_v51 = vmul.f32 %v2063_v46, %v2063_v46  ;;  %v1146_v37 = vsel %vm1120_vm12, %v2063_v46, 0.0 }
 0x25a   :  { %v1144_v52 = vsel %vm1120_vm12, %v2065_v48, 0.0  ;;  %v1171_v53 = vmul.f32 %v2065_v48, %v2065_v48 }
 0x25b   :  { %v1145_v55 = vadd.f32 %v1144_v52, %v1143_v42  ;;  %v1200_v59 = vsel %vm1120_vm12, %v1172_v51, 0.0 }
 0x25c   :  { %v1198_v56 = vsel %vm1120_vm12, %v1171_v53, 0.0 }
 0x25d   :  { %v1199_v57 = vadd.f32 %v1198_v56, %v1197_v44  ;;  %v1147_v58 = vadd.f32 %v1146_v37, %v1145_v55 }
 0x25f   :  { %v1201_v45 = vadd.f32 %v1200_v59, %v1199_v57 }
 0x265   :  { %v2077_v62 = vpop.f32.mrb[6].mxu1 }
 0x266   :  { %v1111_v63 = vpop.f32.mrb[7].mxu1  ;;  %v1174_v0 = vmul.f32 %v2077_v62, %v2077_v62  ;;  %v1150_v4 = vsel %vm1120_vm12, %v2077_v62, 0.0 }
 0x267   :  { %v1148_v1 = vsel %vm1120_vm12, %v1111_v63, 0.0  ;;  %v1173_v2 = vmul.f32 %v1111_v63, %v1111_v63 }
 0x268   :  { %v1149_v3 = vadd.f32 %v1148_v1, %v1147_v58  ;;  %v1204_v10 = vsel %vm1120_vm12, %v1174_v0, 0.0 }
 0x269   :  { %v1202_v5 = vsel %vm1120_vm12, %v1173_v2, 0.0 }
 0x26a   :  { %v1151_v6 = vadd.f32 %v1150_v4, %v1149_v3  ;;  %v1203_v7 = vadd.f32 %v1202_v5, %v1201_v45 }
 0x26c   :  { %v1152_v11 = vrot.slane %v1151_v6, 4  ;;  %v1205_v47 = vadd.f32 %v1204_v10, %v1203_v7 }
 0x26e   :  { %v1153_v12 = vadd.f32 %v1152_v11, %v1151_v6  ;;  %v1206_v13 = vrot.slane %v1205_v47, 4 }
 0x270   :  { %v1154_v14 = vrot.slane %v1153_v12, 2  ;;  %v1207_v15 = vadd.f32 %v1206_v13, %v1205_v47 }
 0x272   :  { %v1155_v16 = vadd.f32 %v1154_v14, %v1153_v12  ;;  %v1208_v54 = vrot.slane %v1207_v15, 2 }
 0x274   :  { %v1156_v17 = vrot.slane %v1155_v16, 1  ;;  %v1209_v20 = vadd.f32 %v1208_v54, %v1207_v15 }
 0x276   :  { %v1157_v21 = vadd.f32 %v1156_v17, %v1155_v16  ;;  %v1210_v22 = vrot.slane %v1209_v20, 1 }
 0x278   :  { %v1158_v23 = vmul.f32 0.0078125, %v1157_v21  ;;  %v1211_v24 = vadd.f32 %v1210_v22, %v1209_v20 }
 0x27a   :  { %v1212_v26 = vmul.f32 0.0078125, %v1211_v24  ;;  %v1213_v27 = vmul.f32 %v1158_v23, %v1158_v23 }
 0x27c   :  { %v1214_v28 = vsub.f32 %v1212_v26, %v1213_v27 }
 0x27e   :  { %v1216_v29 = vadd.f32 1e-05, %v1214_v28 }
 0x280   :  { %1482 = vrsqrt.f32 %v1216_v29 }
 0x28a   :  { %v1483_v30 = vpop.eup %1482 }
 0x28b   :  { %v1218_v38 = vmul.f32 %v1483_v30, %v1215_v34 }
 0x28d   :  { %v1220_v41 = vmul.f32 %v1218_v38, %v1158_v23  ;;  %v1226_v42 = vrot.slane %v1218_v38, %v1225_v35 }
 0x28f   :  { %v1221_v43 = vsub.f32 %v1219_v39, %v1220_v41  ;;  %v1242_v44 = vmul.f32 %v1226_v42, %v1111_v63  ;;  %v1236_v51 = vmul.f32 %v1226_v42, %v2037_v19  ;;  %v1228_v52 = vmul.f32 %v1226_v42, %v1985_v40 }
 0x290   :  { %v1237_v53 = vmul.f32 %v2035_v18, %v1226_v42  ;;  %v1229_v55 = vmul.f32 %v1979_v36, %v1226_v42  ;;  %v1238_v37 = vmul.f32 %v1226_v42, %v2051_v32  ;;  %v1230_v56 = vmul.f32 %v1226_v42, %v1995_v50 }
 0x291   :  { %v1248_v57 = vrot.slane %v1221_v43, %v1225_v35  ;;  %v1239_v58 = vmul.f32 %v2049_v25, %v1226_v42  ;;  %v1231_v59 = vmul.f32 %v1993_v49, %v1226_v42  ;;  %v1240_v45 = vmul.f32 %v1226_v42, %v2065_v48 }
 0x292   :  { %v1232_v63 = vmul.f32 %v1226_v42, %v2009_v61  ;;  %v1241_v19 = vmul.f32 %v2063_v46, %v1226_v42  ;;  %v1233_v40 = vmul.f32 %v2007_v60, %v1226_v42  ;;  %v1234_v18 = vmul.f32 %v1226_v42, %v2023_v9 }
 0x293   :  { %v2105_v36 = vadd.f32 %v1248_v57, %v1242_v44  ;;  %v1258_v32 = vadd.f32 %v1248_v57, %v1236_v51  ;;  %v1250_v0 = vadd.f32 %v1248_v57, %v1228_v52  ;;  %v1259_v50 = vadd.f32 %v1248_v57, %v1237_v53 }
 0x294   :  { %v1251_v1 = vadd.f32 %v1248_v57, %v1229_v55  ;;  %v1260_v2 = vadd.f32 %v1248_v57, %v1238_v37  ;;  %v1252_v25 = vadd.f32 %v1248_v57, %v1230_v56  ;;  %v1261_v3 = vadd.f32 %v1248_v57, %v1239_v58 }
 0x295   :  { %vm1274_vm13 = vcmp.ge.f32.partialorder %v1258_v32, 0.0  ;;  %v1290_v49 = vmul.f32 0.01, %v1258_v32  ;;  %vm1266_vm14 = vcmp.ge.f32.partialorder %v1250_v0, 0.0  ;;  %v1282_v48 = vmul.f32 0.01, %v1250_v0 }
 0x296   :  { %v1291_v46 = vmul.f32 0.01, %v1259_v50  ;;  %v1283_v5 = vmul.f32 0.01, %v1251_v1  ;;  %vm1275_vm15 = vcmp.ge.f32.partialorder %v1259_v50, 0.0  ;;  %vm1267_vm0 = vcmp.ge.f32.partialorder %v1251_v1, 0.0 }
 0x297   :  { %v1306_v61 = vsel %vm1274_vm13, %v1258_v32, %v1290_v49  ;;  %v1298_v4 = vsel %vm1266_vm14, %v1250_v0, %v1282_v48  ;;  %v1253_v60 = vadd.f32 %v1248_v57, %v1231_v59  ;;  %v1292_v9 = vmul.f32 0.01, %v1260_v2 }
 0x298   :  { %1348 = vxpose.xlu1.b32.start [1/8] (short) (narrow) %v1306_v61, 8  ;;  %1314 = vxpose.xlu0.b32.start [1/8] (short) (narrow) %v1298_v4, 8  ;;  %v1262_v6 = vadd.f32 %v1248_v57, %v1240_v45  ;;  %v1254_v7 = vadd.f32 %v1248_v57, %v1232_v63  ;;  %v1263_v10 = vadd.f32 %v1248_v57, %v1241_v19  ;;  %v1284_v12 = vmul.f32 0.01, %v1252_v25 }
 0x299   :  { %v1307_v11 = vsel %vm1275_vm15, %v1259_v50, %v1291_v46  ;;  %v1299_v47 = vsel %vm1267_vm0, %v1251_v1, %v1283_v5  ;;  %v1255_v13 = vadd.f32 %v1248_v57, %v1233_v40  ;;  %vm1276_vm1 = vcmp.ge.f32.partialorder %v1260_v2, 0.0 }
 0x29a   :  { %vm1268_vm2 = vcmp.ge.f32.partialorder %v1252_v25, 0.0  ;;  %v1256_v14 = vadd.f32 %v1248_v57, %v1234_v18  ;;  %v1308_v15 = vsel %vm1276_vm1, %v1260_v2, %v1292_v9  ;;  %v1293_v54 = vmul.f32 0.01, %v1261_v3 }
 0x29b   :  { %v1300_v16 = vsel %vm1268_vm2, %v1252_v25, %v1284_v12  ;;  %v1285_v17 = vmul.f32 0.01, %v1253_v60  ;;  %vm1277_vm3 = vcmp.ge.f32.partialorder %v1261_v3, 0.0  ;;  %vm1269_vm4 = vcmp.ge.f32.partialorder %v1253_v60, 0.0 }
 0x29c   :  { %1349 = vxpose.xlu1.b32.cont [2/8] (short) (narrow) %v1307_v11, 8  ;;  %1315 = vxpose.xlu0.b32.cont [2/8] (short) (narrow) %v1299_v47, 8  ;;  %v1243_v20 = vmul.f32 %v2077_v62, %v1226_v42  ;;  %v1235_v21 = vmul.f32 %v2021_v8, %v1226_v42  ;;  %v1309_v24 = vsel %vm1277_vm3, %v1261_v3, %v1293_v54  ;;  %v1294_v27 = vmul.f32 0.01, %v1262_v6 }
 0x29d   :  { %v1301_v26 = vsel %vm1269_vm4, %v1253_v60, %v1285_v17  ;;  %v1286_v28 = vmul.f32 0.01, %v1254_v7  ;;  %vm1278_vm5 = vcmp.ge.f32.partialorder %v1262_v6, 0.0  ;;  %vm1270_vm6 = vcmp.ge.f32.partialorder %v1254_v7, 0.0 }
 0x29e   :  { %v1265_v22 = vadd.f32 %v1248_v57, %v1243_v20  ;;  %v1257_v23 = vadd.f32 %v1248_v57, %v1235_v21  ;;  %v1310_v29 = vsel %vm1278_vm5, %v1262_v6, %v1294_v27  ;;  %v1295_v33 = vmul.f32 0.01, %v1263_v10 }
 0x29f   :  { %v1302_v31 = vsel %vm1270_vm6, %v1254_v7, %v1286_v28  ;;  %v1287_v34 = vmul.f32 0.01, %v1255_v13  ;;  %vm1279_vm7 = vcmp.ge.f32.partialorder %v1263_v10, 0.0  ;;  %vm1271_vm8 = vcmp.ge.f32.partialorder %v1255_v13, 0.0 }
 0x2a0   :  { %1350 = vxpose.xlu1.b32.cont [3/8] (short) (narrow) %v1308_v15, 8  ;;  %1316 = vxpose.xlu0.b32.cont [3/8] (short) (narrow) %v1300_v16, 8  ;;  %v1311_v62 = vsel %vm1279_vm7, %v1263_v10, %v1295_v33  ;;  %v1296_v35 = vmul.f32 0.01, %v2105_v36  ;;  %v1288_v30 = vmul.f32 0.01, %v1256_v14 }
 0x2a1   :  { %v1303_v8 = vsel %vm1271_vm8, %v1255_v13, %v1287_v34  ;;  %vm1280_vm9 = vcmp.ge.f32.partialorder %v2105_v36, 0.0  ;;  %vm1272_vm10 = vcmp.ge.f32.partialorder %v1256_v14, 0.0  ;;  %v1297_v41 = vmul.f32 0.01, %v1265_v22 }
 0x2a2   :  { %v1312_v38 = vsel %vm1280_vm9, %v2105_v36, %v1296_v35  ;;  %v1304_v39 = vsel %vm1272_vm10, %v1256_v14, %v1288_v30  ;;  %v1289_v42 = vmul.f32 0.01, %v1257_v23  ;;  %vm1281_vm11 = vcmp.ge.f32.partialorder %v1265_v22, 0.0 }
 0x2a3   :  { %vm1273_vm12 = vcmp.ge.f32.partialorder %v1257_v23, 0.0  ;;  %v1313_v43 = vsel %vm1281_vm11, %v1265_v22, %v1297_v41  ;;  %vm1346_vm13 = vcmask 523264  }
 0x2a4   :  { %1351 = vxpose.xlu1.b32.cont [4/8] (short) (narrow) %v1309_v24, 8  ;;  %1317 = vxpose.xlu0.b32.cont [4/8] (short) (narrow) %v1301_v26, 8  ;;  %v1305_v44 = vsel %vm1273_vm12, %v1257_v23, %v1289_v42 }
 0x2a8   :  { %1352 = vxpose.xlu1.b32.cont [5/8] (short) (narrow) %v1310_v29, 8  ;;  %1318 = vxpose.xlu0.b32.cont [5/8] (short) (narrow) %v1302_v31, 8 }
 0x2ac   :  { %1353 = vxpose.xlu1.b32.cont [6/8] (short) (narrow) %v1311_v62, 8  ;;  %1319 = vxpose.xlu0.b32.cont [6/8] (short) (narrow) %v1303_v8, 8 }
 0x2b0   :  { %1354 = vxpose.xlu1.b32.cont [7/8] (short) (narrow) %v1312_v38, 8  ;;  %1320 = vxpose.xlu0.b32.cont [7/8] (short) (narrow) %v1304_v39, 8 }
 0x2b4   :  { %1355 = vxpose.xlu1.b32.end [8/8] (short) (narrow) %v1313_v43, 8  ;;  %1321 = vxpose.xlu0.b32.end [8/8] (short) (narrow) %v1305_v44, 8 }
 0x318   :  { %v1364_v51 = vpop.trf.xlu1  ;;  %v1330_v52 = vpop.trf.xlu0 }
 0x319   :  { %1403 = vst.msk [vmem:[%s2122_s4 + $0x8] sm:$0xff] %vm1346_vm13, %v1364_v51  ;;  %1347 = vst.msk [vmem:[%s2122_s4] sm:$0xff] %vm1346_vm13, %v1330_v52 }

</bundles_post_ra>
